<compile_context>
chip_gen: v7x
topology: tpu7x:2x2x1
jax: 0.10.0
libtpu: 0.0.40
codegen_flags: <defaults>
</compile_context>

<pallas_src>
import functools

import jax
import jax.numpy as jnp
from jax.experimental import pallas as pl
from jax.experimental.pallas import tpu as pltpu


# Raise the default scoped VMEM limit (16 MiB on v5e / 32 MiB on v6e) so larger
# T/F tiles can be used; stays within v7x's 64 MiB physical VMEM (this is only
# a cap, not a reservation).
_VMEM_LIMIT_BYTES = 64 * 1024 * 1024


def _choose_tile(n, preferred):
    """Largest tile <= `preferred` that divides n and is a multiple of 128 (lane/
    sublane friendly); otherwise fall back to the full extent (always legal)."""
    if n <= preferred:
        return n
    t = (preferred // 128) * 128
    while t >= 128:
        if n % t == 0:
            return t
        t -= 128
    return n


def _gelu_tanh(h):
    # GELU, tanh approximation (tanh -> EUP slot, polynomial -> VPU filler).
    # TODO(synk): reference `expert` module may use exact erf-GELU; tanh approx
    # is kept for a guaranteed Mosaic lowering.
    c0 = jnp.float32(0.7978845608028654)   # sqrt(2/pi)
    c1 = jnp.float32(0.044715)
    return 0.5 * h * (1.0 + jnp.tanh(c0 * (h + c1 * h * h * h)))


# ----------------------------------------------------------------------------
# Pass 1: per-expert gate logits only (no candidate writeback, no W2 stream).
# grid = (E, nF, nT); token axis innermost so the W1 f-tile stays resident.
# ----------------------------------------------------------------------------
def _gate_kernel(x_ref, avg_ref, w1_ref, b1_ref, vg_ref,
                 logit_ref, poolh_ref, logit_acc_ref):
    f = pl.program_id(1)
    t = pl.program_id(2)
    nf = pl.num_programs(1)
    nt = pl.num_programs(2)

    @pl.when(jnp.logical_and(f == 0, t == 0))
    def _():
        logit_acc_ref[...] = jnp.zeros_like(logit_acc_ref)

    @pl.when(t == 0)
    def _():
        poolh_ref[...] = jnp.zeros_like(poolh_ref)

    # First FFN layer on this (token-tile, ffn-tile): bf16 MXU, f32 accumulate.
    h = jnp.dot(x_ref[...], w1_ref[0],
                preferred_element_type=jnp.float32) + b1_ref[0]     # (tT, tF) f32
    h = _gelu_tanh(h)

    # Per-sentence pooling of the activations of this tile: (bz, tT) @ (tT, tF).
    poolh_ref[...] += jnp.dot(avg_ref[...], h,
                              preferred_element_type=jnp.float32)   # (bz, tF)

    # Gate contraction with the pre-folded vector v_e = W2[e] @ wg.  The second
    # FFN layer + gate are linear, so they commute with the mean pooling.
    @pl.when(t == nt - 1)
    def _():
        logit_acc_ref[...] += jnp.sum(poolh_ref[...] * vg_ref[0],
                                      axis=-1, keepdims=True)        # (bz, 1)

    @pl.when(jnp.logical_and(f == nf - 1, t == nt - 1))
    def _():
        logit_ref[0] = logit_acc_ref[...]


def _gate_logits(x_tok, avg_mat, w1, b1, v_gate, *, t_tile=512, f_tile=1024):
    T, D = x_tok.shape
    E, _, F = w1.shape
    bz = avg_mat.shape[0]

    tT = _choose_tile(T, t_tile)
    tF = _choose_tile(F, f_tile)
    nT = T // tT
    nF = F // tF

    grid_spec = pltpu.PrefetchScalarGridSpec(
        num_scalar_prefetch=0,
        grid=(E, nF, nT),
        in_specs=[
            pl.BlockSpec((tT, D), lambda e, f, t: (t, 0)),        # x tokens (bf16)
            pl.BlockSpec((bz, tT), lambda e, f, t: (0, t)),       # per-sentence 1/seq
            pl.BlockSpec((1, D, tF), lambda e, f, t: (e, 0, f)),  # W1[e][:, f-tile]
            pl.BlockSpec((1, 1, tF), lambda e, f, t: (e, 0, f)),  # b1[e][f-tile]
            pl.BlockSpec((1, 1, tF), lambda e, f, t: (e, 0, f)),  # v_gate[e][f-tile]
        ],
        out_specs=pl.BlockSpec((1, bz, 1), lambda e, f, t: (e, 0, 0)),
        scratch_shapes=[
            pltpu.VMEM((bz, tF), jnp.float32),   # avg @ gelu(x W1 + b1) accumulator
            pltpu.VMEM((bz, 1), jnp.float32),    # gate-logit accumulator over f-tiles
        ],
    )
    return pl.pallas_call(
        _gate_kernel,
        grid_spec=grid_spec,
        out_shape=jax.ShapeDtypeStruct((E, bz, 1), jnp.float32),
        compiler_params=pltpu.CompilerParams(
            dimension_semantics=("parallel", "arbitrary", "arbitrary"),
            vmem_limit_bytes=_VMEM_LIMIT_BYTES),
    )(x_tok, avg_mat, w1, b1, v_gate)


# ----------------------------------------------------------------------------
# Pass 2: recompute only the selected expert per sentence and scale in-kernel.
# grid = (bz, nF); sentences visited in expert-sorted order so consecutive
# sentences sharing an expert reuse the resident W1/W2 tiles (no re-DMA).
# ----------------------------------------------------------------------------
def _selected_expert_kernel(order_ref, g_ref, x_ref, w1_ref, b1_ref, w2_ref,
                            b2_ref, wscale_ref, out_ref, yacc_ref):
    del order_ref, g_ref  # consumed by the BlockSpec index_maps
    b = pl.program_id(0)
    f = pl.program_id(1)
    nf = pl.num_programs(1)

    @pl.when(f == 0)
    def _():
        yacc_ref[...] = jnp.zeros_like(yacc_ref)

    h = jnp.dot(x_ref[0], w1_ref[0],
                preferred_element_type=jnp.float32) + b1_ref[0]      # (seq, tF)
    h = _gelu_tanh(h)
    yacc_ref[...] += jnp.dot(h.astype(jnp.bfloat16), w2_ref[0],
                             preferred_element_type=jnp.float32)     # (seq, D)

    @pl.when(f == nf - 1)
    def _():
        scale = wscale_ref[b]                                        # SMEM scalar
        out_ref[0] = ((yacc_ref[...] + b2_ref[0]) * scale).astype(out_ref.dtype)


def _selected_expert_ffn(x_bf, w1, b1, w2, b2, order, g_sorted, w_sorted,
                         *, f_tile=1024):
    bz, seq, D = x_bf.shape
    E, _, F = w1.shape
    tF = _choose_tile(F, f_tile)
    nF = F // tF

    grid_spec = pltpu.PrefetchScalarGridSpec(
        num_scalar_prefetch=2,       # order + sorted expert ids -> SMEM index_maps
        grid=(bz, nF),
        in_specs=[
            pl.BlockSpec((1, seq, D), lambda b, f, o, g: (o[b], 0, 0)),  # x[order[b]]
            pl.BlockSpec((1, D, tF), lambda b, f, o, g: (g[b], 0, f)),   # W1[g_sorted[b]]
            pl.BlockSpec((1, 1, tF), lambda b, f, o, g: (g[b], 0, f)),   # b1[g_sorted[b]]
            pl.BlockSpec((1, tF, D), lambda b, f, o, g: (g[b], f, 0)),   # W2[g_sorted[b]]
            pl.BlockSpec((1, 1, D), lambda b, f, o, g: (g[b], 0, 0)),    # b2[g_sorted[b]]
            pl.BlockSpec(memory_space=pltpu.MemorySpace.SMEM),           # sorted gate weights
        ],
        out_specs=pl.BlockSpec((1, seq, D), lambda b, f, o, g: (o[b], 0, 0)),
        scratch_shapes=[pltpu.VMEM((seq, D), jnp.float32)],
    )
    return pl.pallas_call(
        _selected_expert_kernel,
        grid_spec=grid_spec,
        out_shape=jax.ShapeDtypeStruct((bz, seq, D), jnp.float32),
        compiler_params=pltpu.CompilerParams(
            dimension_semantics=("parallel", "arbitrary"),
            vmem_limit_bytes=_VMEM_LIMIT_BYTES),
    )(order, g_sorted, x_bf, w1, b1, w2, b2, w_sorted)


# ----------------------------------------------------------------------------
# MoELayer forward, route_method='gate-sentence-post'
# ----------------------------------------------------------------------------
@functools.partial(jax.jit, static_argnames=("topk", "use_balance_loss", "weight_type"))
def moe_layer_forward(x, attention_mask, params, *, topk=1,
                      use_balance_loss=True, weight_type="raw_prob"):
    del attention_mask  # reference overwrites the mask with ones.
    w1, b1, w2, b2, wg = params              # wg: (D, 1) = nn.Linear(hidden, 1).weight.T
    bz, seq, D = x.shape
    E = w1.shape[0]
    T = bz * seq

    # bf16 operands for the MXU; accumulation stays f32 inside the kernels.
    x_bf = x.astype(jnp.bfloat16)
    x_tok = x_bf.reshape(T, D)
    w1_bf = w1.astype(jnp.bfloat16)
    w2_bf = w2.astype(jnp.bfloat16)

    # Fold the (linear) second FFN layer into the gate for pass 1:
    #   gate(mean(W2 h + b2)) = mean(h) @ (W2 @ wg) + b2 @ wg
    # so pass 1 never streams W2 and never forms per-token expert outputs.
    wg_bf = wg.astype(jnp.bfloat16)
    v_gate = jax.lax.dot_general(
        w2_bf, wg_bf, dimension_numbers=(((2,), (0,)), ((), ())),
        preferred_element_type=jnp.float32)[..., 0]                    # (E, F) f32
    v_gate = v_gate[:, None, :]                                        # (E, 1, F)
    c_gate = jnp.einsum("eod,do->e", b2, wg)                           # (E,) f32

    # Averaging matrix: avg[b, t] = 1/seq if token t belongs to sentence b
    # (the reference overwrites attention_mask with ones => divisor is seq).
    sent_id = jnp.repeat(jnp.arange(bz), seq)                          # (T,)
    avg_mat = (jnp.arange(bz)[:, None] == sent_id[None, :]).astype(jnp.float32) / seq

    logits = _gate_logits(x_tok, avg_mat, w1_bf, b1, v_gate)           # (E, bz, 1)
    logits_gate = jnp.transpose(logits[:, :, 0]) + c_gate[None, :]     # (bz, E)

    prob_gate = jax.nn.softmax(logits_gate, axis=-1)                   # (bz, E)
    topk_values, gate_idx = jax.lax.top_k(prob_gate, topk)             # (bz, k)

    one_hot = jax.nn.one_hot(gate_idx, E, dtype=jnp.int32)             # (bz, k, E)
    num_sentences = (one_hot.sum(axis=1) > 0).sum(axis=0)              # (E,) gate_load

    if use_balance_loss:
        P = prob_gate.mean(axis=0)
        f = num_sentences.astype(jnp.float32)
        f = f / f.sum()
        balance_loss = E * jnp.sum(P * f)
    else:
        balance_loss = jnp.float32(0.0)

    importance = prob_gate.sum(axis=0)                                  # (E,)
    importance_loss = (jnp.std(importance, ddof=1) / jnp.mean(importance)) ** 2

    prob_gate_topk = jnp.zeros_like(prob_gate).at[
        jnp.arange(bz)[:, None], gate_idx].set(topk_values)

    if weight_type == "average":
        prob_gate_normalized = prob_gate_topk / prob_gate_topk.sum(axis=1, keepdims=True)
    elif weight_type == "raw_prob":
        prob_gate_normalized = prob_gate_topk
    elif weight_type == "softmax_norm":
        # TODO(synk): softmax_norm puts nonzero weight on every expert and needs the
        # dense all-expert combine; only the sparse top-k recompute path is kernelized.
        raise NotImplementedError(
            "weight_type='softmax_norm' is not supported by the sparse two-pass kernel")
    else:
        raise KeyError("weight_type not supported")

    # Pass 2: recompute only the selected expert(s) per sentence; gate weight is
    # applied inside the kernel (no E*T*D candidate round-trip, no zero-multiplies).
    # Sentences are visited in expert-sorted order so sentences that share an
    # expert reuse the already-resident weight tiles; outputs land directly at
    # their original positions via the prefetch-driven output index_map.
    rows = jnp.arange(bz)
    moe_result = jnp.zeros((bz, seq, D), jnp.float32)
    for k in range(topk):
        idx_k = gate_idx[:, k].astype(jnp.int32)                       # (bz,)
        w_k = prob_gate_normalized[rows, idx_k].astype(jnp.float32)    # (bz,)
        order = jnp.argsort(idx_k).astype(jnp.int32)                   # (bz,)
        g_sorted = idx_k[order]
        w_sorted = w_k[order]
        moe_result = moe_result + _selected_expert_ffn(
            x_bf, w1_bf, b1, w2_bf, b2, order, g_sorted, w_sorted)

    return moe_result, balance_loss + importance_loss, prob_gate_normalized


# ----------------------------------------------------------------------------
# Deterministic parameter construction (synthetic; no checkpoint loading).
# ----------------------------------------------------------------------------
def make_params(key, num_experts, hidden, ffn):
    ks = jax.random.split(key, 5)
    scale1 = 1.0 / jnp.sqrt(hidden)
    scale2 = 1.0 / jnp.sqrt(ffn)
    w1 = jax.random.normal(ks[0], (num_experts, hidden, ffn), jnp.float32) * scale1
    b1 = jax.random.normal(ks[1], (num_experts, 1, ffn), jnp.float32) * 0.01
    w2 = jax.random.normal(ks[2], (num_experts, ffn, hidden), jnp.float32) * scale2
    b2 = jax.random.normal(ks[3], (num_experts, 1, hidden), jnp.float32) * 0.01
    wg = jax.random.normal(ks[4], (hidden, 1), jnp.float32) * scale1   # Linear(hidden, 1, bias=False)
    return (w1, b1, w2, b2, wg)


if __name__ == "__main__":
    # TODO(synk): only the 'gate-sentence-post' routing path is implemented; the
    # sort/split-based 'gate-token'/'gate-sentence' paths need data-dependent
    # token regrouping that is out of scope for this synthetic kernel.
    bz, seq, hidden, ffn, num_experts = 2, 8, 32, 64, 4

    key = jax.random.PRNGKey(0)
    kx, kp = jax.random.split(key)
    x = jax.random.normal(kx, (bz, seq, hidden), jnp.float32)
    attention_mask = jnp.ones((bz, seq), jnp.float32)
    params = make_params(kp, num_experts, hidden, ffn)

    out, loss, gate_weights = moe_layer_forward(
        x, attention_mask, params, topk=1,
        use_balance_loss=True, weight_type="raw_prob")
    jax.block_until_ready((out, loss, gate_weights))

    assert out.shape == (bz, seq, hidden)
    assert gate_weights.shape == (bz, num_experts)

    # ---- pure-JAX f32 sanity checks (smooth quantities only, tie-safe) --------
    w1f, b1f, w2f, b2f, wgf = params

    def ref_expert_outputs(xf):
        h = jnp.einsum("bsd,edf->ebsf", xf, w1f) + b1f[:, None]
        c0, c1 = 0.7978845608028654, 0.044715
        h = 0.5 * h * (1.0 + jnp.tanh(c0 * (h + c1 * h * h * h)))
        return jnp.einsum("ebsf,efd->ebsd", h, w2f) + b2f[:, None]

    y_ref = ref_expert_outputs(x)                                    # (E, bz, seq, D)
    pooled_ref = y_ref.mean(axis=2)                                  # (E, bz, D)
    logits_ref = jnp.einsum("ebd,dk->bek", pooled_ref, wgf)[..., 0]  # (bz, E)
    probs_ref = jax.nn.softmax(logits_ref, axis=-1)

    # top-1 raw_prob weight per sentence should match the max reference probability.
    assert jnp.allclose(gate_weights.sum(axis=1), probs_ref.max(axis=1), atol=2e-2)
    # pass-2 check: f32 expert outputs combined with the kernel's own gate weights.
    hybrid_ref = jnp.einsum("be,ebsd->bsd", gate_weights, y_ref)
    assert jnp.allclose(out, hybrid_ref, atol=5e-2, rtol=5e-2)

    print("KERNEL_OK")
</pallas_src>

<mosaic_0001>
module attributes {stable_mosaic.version = 11 : i64} {
  func.func @_gate_kernel(%arg0: i32, %arg1: i32, %arg2: i32, %arg3: memref<16x32xbf16, #tpu.memory_space<vmem>>, %arg4: memref<2x16xf32, #tpu.memory_space<vmem>>, %arg5: memref<1x32x64xbf16, #tpu.memory_space<vmem>>, %arg6: memref<1x1x64xf32, #tpu.memory_space<vmem>>, %arg7: memref<1x1x64xf32, #tpu.memory_space<vmem>>, %arg8: memref<1x2x1xf32, #tpu.memory_space<vmem>>, %arg9: memref<2x64xf32, #tpu.memory_space<vmem>>, %arg10: memref<2x1xf32, #tpu.memory_space<vmem>>) attributes {dimension_semantics = [#tpu.dimension_semantics<parallel>, #tpu.dimension_semantics<arbitrary>, #tpu.dimension_semantics<arbitrary>], iteration_bounds = array<i64: 4, 1, 1>, scalar_prefetch = 0 : i64, scratch_operands = 2 : i64, tpu.core_type = #tpu.core_type<tc>, window_params = [{transform_indices = @transform_0, window_bounds = array<i64: 16, 32>}, {transform_indices = @transform_1, window_bounds = array<i64: 2, 16>}, {transform_indices = @transform_2, window_bounds = array<i64: 1, 32, 64>}, {transform_indices = @transform_3, window_bounds = array<i64: 1, 1, 64>}, {transform_indices = @transform_4, window_bounds = array<i64: 1, 1, 64>}, {transform_indices = @transform_5, window_bounds = array<i64: 1, 2, 1>}]} {
    %c0_i32 = arith.constant 0 : i32
    %0 = arith.cmpi eq, %arg1, %c0_i32 : i32
    %c0_i32_0 = arith.constant 0 : i32
    %1 = arith.cmpi eq, %arg2, %c0_i32_0 : i32
    %2 = arith.andi %0, %1 : i1
    %3 = arith.extui %2 : i1 to i32
    %c0_i32_1 = arith.constant 0 : i32
    %4 = arith.cmpi ne, %3, %c0_i32_1 : i32
    scf.if %4 {
      %cst_27 = arith.constant 0.000000e+00 : f32
      %42 = vector.broadcast %cst_27 : f32 to vector<2x1xf32>
      %c0_28 = arith.constant 0 : index
      %c0_29 = arith.constant 0 : index
      %43 = vector.load %arg10[%c0_28, %c0_29] : memref<2x1xf32, #tpu.memory_space<vmem>>, vector<2x1xf32>
      tpu.vector_store %arg10[%c0_28, %c0_29], %42 {strides = array<i32>} : memref<2x1xf32, #tpu.memory_space<vmem>>, vector<2x1xf32>,
    } else {
    }
    %c0_i32_2 = arith.constant 0 : i32
    %5 = arith.cmpi eq, %arg2, %c0_i32_2 : i32
    %6 = arith.extui %5 : i1 to i32
    %c0_i32_3 = arith.constant 0 : i32
    %7 = arith.cmpi ne, %6, %c0_i32_3 : i32
    scf.if %7 {
      %cst_27 = arith.constant 0.000000e+00 : f32
      %42 = vector.broadcast %cst_27 : f32 to vector<2x64xf32>
      %c0_28 = arith.constant 0 : index
      %c0_29 = arith.constant 0 : index
      %43 = vector.load %arg9[%c0_28, %c0_29] : memref<2x64xf32, #tpu.memory_space<vmem>>, vector<2x64xf32>
      tpu.vector_store %arg9[%c0_28, %c0_29], %42 {strides = array<i32>} : memref<2x64xf32, #tpu.memory_space<vmem>>, vector<2x64xf32>,
    } else {
    }
    %c0 = arith.constant 0 : index
    %c0_4 = arith.constant 0 : index
    %8 = vector.load %arg3[%c0, %c0_4] : memref<16x32xbf16, #tpu.memory_space<vmem>>, vector<16x32xbf16>
    %c0_5 = arith.constant 0 : index
    %c0_6 = arith.constant 0 : index
    %c0_7 = arith.constant 0 : index
    %9 = vector.load %arg5[%c0_5, %c0_6, %c0_7] : memref<1x32x64xbf16, #tpu.memory_space<vmem>>, vector<1x32x64xbf16>
    %10 = vector.shape_cast %9 : vector<1x32x64xbf16> to vector<32x64xbf16>
    %cst = arith.constant dense<0.000000e+00> : vector<16x64xf32>
    %11 = tpu.matmul %8, %10, %cst {dimension_numbers = #tpu.dot_dimension_numbers<[1], [0], [0], [1], [0, 0, 1, 1], [], []>} : vector<16x32xbf16>, vector<32x64xbf16>, vector<16x64xf32> -> vector<16x64xf32>
    %c0_8 = arith.constant 0 : index
    %c0_9 = arith.constant 0 : index
    %c0_10 = arith.constant 0 : index
    %12 = vector.load %arg6[%c0_8, %c0_9, %c0_10] : memref<1x1x64xf32, #tpu.memory_space<vmem>>, vector<1x1x64xf32>
    %13 = vector.shape_cast %12 : vector<1x1x64xf32> to vector<1x64xf32>
    %14 = vector.broadcast %13 : vector<1x64xf32> to vector<16x64xf32>
    %15 = arith.addf %11, %14 : vector<16x64xf32>
    %cst_11 = arith.constant 5.000000e-01 : f32
    %16 = vector.broadcast %cst_11 : f32 to vector<16x64xf32>
    %17 = arith.mulf %16, %15 : vector<16x64xf32>
    %cst_12 = arith.constant 4.471500e-02 : f32
    %18 = vector.broadcast %cst_12 : f32 to vector<16x64xf32>
    %19 = arith.mulf %18, %15 : vector<16x64xf32>
    %20 = arith.mulf %19, %15 : vector<16x64xf32>
    %21 = arith.mulf %20, %15 : vector<16x64xf32>
    %22 = arith.addf %15, %21 : vector<16x64xf32>
    %cst_13 = arith.constant 0.797884583 : f32
    %23 = vector.broadcast %cst_13 : f32 to vector<16x64xf32>
    %24 = arith.mulf %23, %22 : vector<16x64xf32>
    %25 = math.tanh %24 : vector<16x64xf32>
    %cst_14 = arith.constant 1.000000e+00 : f32
    %26 = vector.broadcast %cst_14 : f32 to vector<16x64xf32>
    %27 = arith.addf %26, %25 : vector<16x64xf32>
    %28 = arith.mulf %17, %27 : vector<16x64xf32>
    %c0_15 = arith.constant 0 : index
    %c0_16 = arith.constant 0 : index
    %29 = vector.load %arg9[%c0_15, %c0_16] : memref<2x64xf32, #tpu.memory_space<vmem>>, vector<2x64xf32>
    %c0_17 = arith.constant 0 : index
    %c0_18 = arith.constant 0 : index
    %30 = vector.load %arg4[%c0_17, %c0_18] : memref<2x16xf32, #tpu.memory_space<vmem>>, vector<2x16xf32>
    %cst_19 = arith.constant dense<0.000000e+00> : vector<2x64xf32>
    %31 = tpu.matmul %30, %28, %cst_19 {dimension_numbers = #tpu.dot_dimension_numbers<[1], [0], [0], [1], [0, 0, 1, 1], [], []>} : vector<2x16xf32>, vector<16x64xf32>, vector<2x64xf32> -> vector<2x64xf32>
    %32 = arith.addf %29, %31 : vector<2x64xf32>
    %c0_20 = arith.constant 0 : index
    %c0_21 = arith.constant 0 : index
    %33 = vector.load %arg9[%c0_20, %c0_21] : memref<2x64xf32, #tpu.memory_space<vmem>>, vector<2x64xf32>
    tpu.vector_store %arg9[%c0_20, %c0_21], %32 {strides = array<i32>} : memref<2x64xf32, #tpu.memory_space<vmem>>, vector<2x64xf32>,
    %c0_i32_22 = arith.constant 0 : i32
    %34 = arith.cmpi eq, %arg2, %c0_i32_22 : i32
    %35 = arith.extui %34 : i1 to i32
    %c0_i32_23 = arith.constant 0 : i32
    %36 = arith.cmpi ne, %35, %c0_i32_23 : i32
    scf.if %36 {
      %c0_27 = arith.constant 0 : index
      %c0_28 = arith.constant 0 : index
      %42 = vector.load %arg10[%c0_27, %c0_28] : memref<2x1xf32, #tpu.memory_space<vmem>>, vector<2x1xf32>
      %c0_29 = arith.constant 0 : index
      %c0_30 = arith.constant 0 : index
      %43 = vector.load %arg9[%c0_29, %c0_30] : memref<2x64xf32, #tpu.memory_space<vmem>>, vector<2x64xf32>
      %c0_31 = arith.constant 0 : index
      %c0_32 = arith.constant 0 : index
      %c0_33 = arith.constant 0 : index
      %44 = vector.load %arg7[%c0_31, %c0_32, %c0_33] : memref<1x1x64xf32, #tpu.memory_space<vmem>>, vector<1x1x64xf32>
      %45 = vector.shape_cast %44 : vector<1x1x64xf32> to vector<1x64xf32>
      %46 = vector.broadcast %45 : vector<1x64xf32> to vector<2x64xf32>
      %47 = arith.mulf %43, %46 : vector<2x64xf32>
      %cst_34 = arith.constant dense<0.000000e+00> : vector<2xf32>
      %48 = vector.multi_reduction <add>, %47, %cst_34 [1] : vector<2x64xf32> to vector<2xf32>
      %49 = vector.shape_cast %48 : vector<2xf32> to vector<2x1xf32>
      %50 = arith.addf %42, %49 : vector<2x1xf32>
      %c0_35 = arith.constant 0 : index
      %c0_36 = arith.constant 0 : index
      %51 = vector.load %arg10[%c0_35, %c0_36] : memref<2x1xf32, #tpu.memory_space<vmem>>, vector<2x1xf32>
      tpu.vector_store %arg10[%c0_35, %c0_36], %50 {strides = array<i32>} : memref<2x1xf32, #tpu.memory_space<vmem>>, vector<2x1xf32>,
    } else {
    }
    %c0_i32_24 = arith.constant 0 : i32
    %37 = arith.cmpi eq, %arg1, %c0_i32_24 : i32
    %c0_i32_25 = arith.constant 0 : i32
    %38 = arith.cmpi eq, %arg2, %c0_i32_25 : i32
    %39 = arith.andi %37, %38 : i1
    %40 = arith.extui %39 : i1 to i32
    %c0_i32_26 = arith.constant 0 : i32
    %41 = arith.cmpi ne, %40, %c0_i32_26 : i32
    scf.if %41 {
      %c0_27 = arith.constant 0 : index
      %c0_28 = arith.constant 0 : index
      %42 = vector.load %arg10[%c0_27, %c0_28] : memref<2x1xf32, #tpu.memory_space<vmem>>, vector<2x1xf32>
      %c0_29 = arith.constant 0 : index
      %c0_30 = arith.constant 0 : index
      %c0_31 = arith.constant 0 : index
      %43 = vector.load %arg8[%c0_29, %c0_30, %c0_31] : memref<1x2x1xf32, #tpu.memory_space<vmem>>, vector<1x2x1xf32>
      %44 = vector.shape_cast %43 : vector<1x2x1xf32> to vector<2x1xf32>
      %45 = vector.shape_cast %42 : vector<2x1xf32> to vector<1x2x1xf32>
      tpu.vector_store %arg8[%c0_29, %c0_30, %c0_31], %45 {strides = array<i32>} : memref<1x2x1xf32, #tpu.memory_space<vmem>>, vector<1x2x1xf32>,
    } else {
    }
    return
  }
  func.func @transform_0(%arg0: i32, %arg1: i32, %arg2: i32) -> (i32, i32) {
    %c0_i32 = arith.constant 0 : i32
    %c0_i32_0 = arith.constant 0 : i32
    return %arg2, %c0_i32 : i32, i32
  }
  func.func @transform_1(%arg0: i32, %arg1: i32, %arg2: i32) -> (i32, i32) {
    %c0_i32 = arith.constant 0 : i32
    %c0_i32_0 = arith.constant 0 : i32
    return %c0_i32, %arg2 : i32, i32
  }
  func.func @transform_2(%arg0: i32, %arg1: i32, %arg2: i32) -> (i32, i32, i32) {
    %c0_i32 = arith.constant 0 : i32
    %c0_i32_0 = arith.constant 0 : i32
    return %arg0, %c0_i32, %arg1 : i32, i32, i32
  }
  func.func @transform_3(%arg0: i32, %arg1: i32, %arg2: i32) -> (i32, i32, i32) {
    %c0_i32 = arith.constant 0 : i32
    %c0_i32_0 = arith.constant 0 : i32
    return %arg0, %c0_i32, %arg1 : i32, i32, i32
  }
  func.func @transform_4(%arg0: i32, %arg1: i32, %arg2: i32) -> (i32, i32, i32) {
    %c0_i32 = arith.constant 0 : i32
    %c0_i32_0 = arith.constant 0 : i32
    return %arg0, %c0_i32, %arg1 : i32, i32, i32
  }
  func.func @transform_5(%arg0: i32, %arg1: i32, %arg2: i32) -> (i32, i32, i32) {
    %c0_i32 = arith.constant 0 : i32
    %c0_i32_0 = arith.constant 0 : i32
    %c0_i32_1 = arith.constant 0 : i32
    return %arg0, %c0_i32, %c0_i32_0 : i32, i32, i32
  }
}

module attributes {stable_mosaic.version = 11 : i64} {
  func.func @_selected_expert_kernel(%arg0: i32, %arg1: i32, %arg2: memref<2xi32, #tpu.memory_space<smem>>, %arg3: memref<2xi32, #tpu.memory_space<smem>>, %arg4: memref<1x8x32xbf16, #tpu.memory_space<vmem>>, %arg5: memref<1x32x64xbf16, #tpu.memory_space<vmem>>, %arg6: memref<1x1x64xf32, #tpu.memory_space<vmem>>, %arg7: memref<1x64x32xbf16, #tpu.memory_space<vmem>>, %arg8: memref<1x1x32xf32, #tpu.memory_space<vmem>>, %arg9: memref<2xf32, #tpu.memory_space<smem>>, %arg10: memref<1x8x32xf32, #tpu.memory_space<vmem>>, %arg11: memref<8x32xf32, #tpu.memory_space<vmem>>) attributes {dimension_semantics = [#tpu.dimension_semantics<parallel>, #tpu.dimension_semantics<arbitrary>], iteration_bounds = array<i64: 2, 1>, scalar_prefetch = 2 : i64, scratch_operands = 1 : i64, tpu.core_type = #tpu.core_type<tc>, window_params = [{transform_indices = @transform_0, window_bounds = array<i64: 1, 8, 32>}, {transform_indices = @transform_1, window_bounds = array<i64: 1, 32, 64>}, {transform_indices = @transform_2, window_bounds = array<i64: 1, 1, 64>}, {transform_indices = @transform_3, window_bounds = array<i64: 1, 64, 32>}, {transform_indices = @transform_4, window_bounds = array<i64: 1, 1, 32>}, {transform_indices = @transform_5, window_bounds = array<i64: 2>}, {transform_indices = @transform_6, window_bounds = array<i64: 1, 8, 32>}]} {
    %c0_i32 = arith.constant 0 : i32
    %0 = arith.cmpi eq, %arg1, %c0_i32 : i32
    %1 = arith.extui %0 : i1 to i32
    %c0_i32_0 = arith.constant 0 : i32
    %2 = arith.cmpi ne, %1, %c0_i32_0 : i32
    scf.if %2 {
      %cst_23 = arith.constant 0.000000e+00 : f32
      %35 = vector.broadcast %cst_23 : f32 to vector<8x32xf32>
      %c0_24 = arith.constant 0 : index
      %c0_25 = arith.constant 0 : index
      %36 = vector.load %arg11[%c0_24, %c0_25] : memref<8x32xf32, #tpu.memory_space<vmem>>, vector<8x32xf32>
      tpu.vector_store %arg11[%c0_24, %c0_25], %35 {strides = array<i32>} : memref<8x32xf32, #tpu.memory_space<vmem>>, vector<8x32xf32>,
    } else {
    }
    %c0 = arith.constant 0 : index
    %c0_1 = arith.constant 0 : index
    %c0_2 = arith.constant 0 : index
    %3 = vector.load %arg4[%c0, %c0_1, %c0_2] : memref<1x8x32xbf16, #tpu.memory_space<vmem>>, vector<1x8x32xbf16>
    %4 = vector.shape_cast %3 : vector<1x8x32xbf16> to vector<8x32xbf16>
    %c0_3 = arith.constant 0 : index
    %c0_4 = arith.constant 0 : index
    %c0_5 = arith.constant 0 : index
    %5 = vector.load %arg5[%c0_3, %c0_4, %c0_5] : memref<1x32x64xbf16, #tpu.memory_space<vmem>>, vector<1x32x64xbf16>
    %6 = vector.shape_cast %5 : vector<1x32x64xbf16> to vector<32x64xbf16>
    %cst = arith.constant dense<0.000000e+00> : vector<8x64xf32>
    %7 = tpu.matmul %4, %6, %cst {dimension_numbers = #tpu.dot_dimension_numbers<[1], [0], [0], [1], [0, 0, 1, 1], [], []>} : vector<8x32xbf16>, vector<32x64xbf16>, vector<8x64xf32> -> vector<8x64xf32>
    %c0_6 = arith.constant 0 : index
    %c0_7 = arith.constant 0 : index
    %c0_8 = arith.constant 0 : index
    %8 = vector.load %arg6[%c0_6, %c0_7, %c0_8] : memref<1x1x64xf32, #tpu.memory_space<vmem>>, vector<1x1x64xf32>
    %9 = vector.shape_cast %8 : vector<1x1x64xf32> to vector<1x64xf32>
    %10 = vector.broadcast %9 : vector<1x64xf32> to vector<8x64xf32>
    %11 = arith.addf %7, %10 : vector<8x64xf32>
    %cst_9 = arith.constant 5.000000e-01 : f32
    %12 = vector.broadcast %cst_9 : f32 to vector<8x64xf32>
    %13 = arith.mulf %12, %11 : vector<8x64xf32>
    %cst_10 = arith.constant 4.471500e-02 : f32
    %14 = vector.broadcast %cst_10 : f32 to vector<8x64xf32>
    %15 = arith.mulf %14, %11 : vector<8x64xf32>
    %16 = arith.mulf %15, %11 : vector<8x64xf32>
    %17 = arith.mulf %16, %11 : vector<8x64xf32>
    %18 = arith.addf %11, %17 : vector<8x64xf32>
    %cst_11 = arith.constant 0.797884583 : f32
    %19 = vector.broadcast %cst_11 : f32 to vector<8x64xf32>
    %20 = arith.mulf %19, %18 : vector<8x64xf32>
    %21 = math.tanh %20 : vector<8x64xf32>
    %cst_12 = arith.constant 1.000000e+00 : f32
    %22 = vector.broadcast %cst_12 : f32 to vector<8x64xf32>
    %23 = arith.addf %22, %21 : vector<8x64xf32>
    %24 = arith.mulf %13, %23 : vector<8x64xf32>
    %c0_13 = arith.constant 0 : index
    %c0_14 = arith.constant 0 : index
    %25 = vector.load %arg11[%c0_13, %c0_14] : memref<8x32xf32, #tpu.memory_space<vmem>>, vector<8x32xf32>
    %26 = arith.truncf %24 : vector<8x64xf32> to vector<8x64xbf16>
    %c0_15 = arith.constant 0 : index
    %c0_16 = arith.constant 0 : index
    %c0_17 = arith.constant 0 : index
    %27 = vector.load %arg7[%c0_15, %c0_16, %c0_17] : memref<1x64x32xbf16, #tpu.memory_space<vmem>>, vector<1x64x32xbf16>
    %28 = vector.shape_cast %27 : vector<1x64x32xbf16> to vector<64x32xbf16>
    %cst_18 = arith.constant dense<0.000000e+00> : vector<8x32xf32>
    %29 = tpu.matmul %26, %28, %cst_18 {dimension_numbers = #tpu.dot_dimension_numbers<[1], [0], [0], [1], [0, 0, 1, 1], [], []>} : vector<8x64xbf16>, vector<64x32xbf16>, vector<8x32xf32> -> vector<8x32xf32>
    %30 = arith.addf %25, %29 : vector<8x32xf32>
    %c0_19 = arith.constant 0 : index
    %c0_20 = arith.constant 0 : index
    %31 = vector.load %arg11[%c0_19, %c0_20] : memref<8x32xf32, #tpu.memory_space<vmem>>, vector<8x32xf32>
    tpu.vector_store %arg11[%c0_19, %c0_20], %30 {strides = array<i32>} : memref<8x32xf32, #tpu.memory_space<vmem>>, vector<8x32xf32>,
    %c0_i32_21 = arith.constant 0 : i32
    %32 = arith.cmpi eq, %arg1, %c0_i32_21 : i32
    %33 = arith.extui %32 : i1 to i32
    %c0_i32_22 = arith.constant 0 : i32
    %34 = arith.cmpi ne, %33, %c0_i32_22 : i32
    scf.if %34 {
      %35 = arith.index_cast %arg0 : i32 to index
      %36 = memref.load %arg9[%35] : memref<2xf32, #tpu.memory_space<smem>>
      %c0_23 = arith.constant 0 : index
      %c0_24 = arith.constant 0 : index
      %37 = vector.load %arg11[%c0_23, %c0_24] : memref<8x32xf32, #tpu.memory_space<vmem>>, vector<8x32xf32>
      %c0_25 = arith.constant 0 : index
      %c0_26 = arith.constant 0 : index
      %c0_27 = arith.constant 0 : index
      %38 = vector.load %arg8[%c0_25, %c0_26, %c0_27] : memref<1x1x32xf32, #tpu.memory_space<vmem>>, vector<1x1x32xf32>
      %39 = vector.shape_cast %38 : vector<1x1x32xf32> to vector<1x32xf32>
      %40 = vector.broadcast %39 : vector<1x32xf32> to vector<8x32xf32>
      %41 = arith.addf %37, %40 : vector<8x32xf32>
      %42 = vector.broadcast %36 : f32 to vector<8x32xf32>
      %43 = arith.mulf %41, %42 : vector<8x32xf32>
      %c0_28 = arith.constant 0 : index
      %c0_29 = arith.constant 0 : index
      %c0_30 = arith.constant 0 : index
      %44 = vector.load %arg10[%c0_28, %c0_29, %c0_30] : memref<1x8x32xf32, #tpu.memory_space<vmem>>, vector<1x8x32xf32>
      %45 = vector.shape_cast %44 : vector<1x8x32xf32> to vector<8x32xf32>
      %46 = vector.shape_cast %43 : vector<8x32xf32> to vector<1x8x32xf32>
      tpu.vector_store %arg10[%c0_28, %c0_29, %c0_30], %46 {strides = array<i32>} : memref<1x8x32xf32, #tpu.memory_space<vmem>>, vector<1x8x32xf32>,
    } else {
    }
    return
  }
  func.func @transform_0(%arg0: i32, %arg1: i32, %arg2: memref<2xi32, #tpu.memory_space<smem>>, %arg3: memref<2xi32, #tpu.memory_space<smem>>) -> (i32, i32, i32) {
    %0 = arith.index_cast %arg0 : i32 to index
    %1 = memref.load %arg2[%0] : memref<2xi32, #tpu.memory_space<smem>>
    %c0_i32 = arith.constant 0 : i32
    %c0_i32_0 = arith.constant 0 : i32
    %c0_i32_1 = arith.constant 0 : i32
    return %1, %c0_i32, %c0_i32_0 : i32, i32, i32
  }
  func.func @transform_1(%arg0: i32, %arg1: i32, %arg2: memref<2xi32, #tpu.memory_space<smem>>, %arg3: memref<2xi32, #tpu.memory_space<smem>>) -> (i32, i32, i32) {
    %0 = arith.index_cast %arg0 : i32 to index
    %1 = memref.load %arg3[%0] : memref<2xi32, #tpu.memory_space<smem>>
    %c0_i32 = arith.constant 0 : i32
    %c0_i32_0 = arith.constant 0 : i32
    return %1, %c0_i32, %arg1 : i32, i32, i32
  }
  func.func @transform_2(%arg0: i32, %arg1: i32, %arg2: memref<2xi32, #tpu.memory_space<smem>>, %arg3: memref<2xi32, #tpu.memory_space<smem>>) -> (i32, i32, i32) {
    %0 = arith.index_cast %arg0 : i32 to index
    %1 = memref.load %arg3[%0] : memref<2xi32, #tpu.memory_space<smem>>
    %c0_i32 = arith.constant 0 : i32
    %c0_i32_0 = arith.constant 0 : i32
    return %1, %c0_i32, %arg1 : i32, i32, i32
  }
  func.func @transform_3(%arg0: i32, %arg1: i32, %arg2: memref<2xi32, #tpu.memory_space<smem>>, %arg3: memref<2xi32, #tpu.memory_space<smem>>) -> (i32, i32, i32) {
    %0 = arith.index_cast %arg0 : i32 to index
    %1 = memref.load %arg3[%0] : memref<2xi32, #tpu.memory_space<smem>>
    %c0_i32 = arith.constant 0 : i32
    %c0_i32_0 = arith.constant 0 : i32
    return %1, %arg1, %c0_i32 : i32, i32, i32
  }
  func.func @transform_4(%arg0: i32, %arg1: i32, %arg2: memref<2xi32, #tpu.memory_space<smem>>, %arg3: memref<2xi32, #tpu.memory_space<smem>>) -> (i32, i32, i32) {
    %0 = arith.index_cast %arg0 : i32 to index
    %1 = memref.load %arg3[%0] : memref<2xi32, #tpu.memory_space<smem>>
    %c0_i32 = arith.constant 0 : i32
    %c0_i32_0 = arith.constant 0 : i32
    %c0_i32_1 = arith.constant 0 : i32
    return %1, %c0_i32, %c0_i32_0 : i32, i32, i32
  }
  func.func @transform_5(%arg0: i32, %arg1: i32, %arg2: memref<2xi32, #tpu.memory_space<smem>>, %arg3: memref<2xi32, #tpu.memory_space<smem>>) -> i32 {
    %c0_i32 = arith.constant 0 : i32
    %c0_i32_0 = arith.constant 0 : i32
    return %c0_i32 : i32
  }
  func.func @transform_6(%arg0: i32, %arg1: i32, %arg2: memref<2xi32, #tpu.memory_space<smem>>, %arg3: memref<2xi32, #tpu.memory_space<smem>>) -> (i32, i32, i32) {
    %0 = arith.index_cast %arg0 : i32 to index
    %1 = memref.load %arg2[%0] : memref<2xi32, #tpu.memory_space<smem>>
    %c0_i32 = arith.constant 0 : i32
    %c0_i32_0 = arith.constant 0 : i32
    %c0_i32_1 = arith.constant 0 : i32
    return %1, %c0_i32, %c0_i32_0 : i32, i32, i32
  }
}

</mosaic_0001>

<bundles_post_ra>
// kernel: eq.25
= control target key start
LH: loop header
LB: loop body
LE: loop exit
PB: predicated region body
PF: predicated region fallthrough
CT: control target
= control target key end

     0   :  { %vm7_vm0 = vcmask 64512   ;;  %vm13_vm1 = vcmask 130112   ;;  %s39_s0 = inlined_call_operand.vmem [shape: s32[2,8], index: 0, kind: input, shape index: {}]   ;;  %s40_s1 = inlined_call_operand.vmem [shape: s32[16], index: 1, kind: output, shape index: {}]  }
   0x1   :  { %v4_v0 = vld [vmem:[%s39_s0] sm:$0x3]  ;;  %s22_s0 = smov 8  }
   0x2   :  { %5 = vst [vmem:[#allocation1] sm:$0x3] %v4_v0 }
   0x9   :  { %v10_v1 = vld [vmem:[#allocation1 + $0x1] sm:$0x1]   ;;  %v6_v2 = vld [vmem:[#allocation1] sm:$0x1]  }
   0xa   :  { %11 = vrot.lane.b32.xlu0 %v10_v1, %s22_s0  ;;  %8 = vst.msk [vmem:[#allocation0] sm:$0x1] %vm7_vm0, %v6_v2  }
  0x7c   :  { %v12_v3 = vpop.permute.xlu0 %11  }
  0x7d   :  { %14 = vst.msk [vmem:[#allocation0] sm:$0x1] %vm13_vm1, %v12_v3  }
  0x84   :  { %v18_v4 = vld [vmem:[#allocation0] sm:$0x1] }
  0x85   :  { %20 = vst [vmem:[%s40_s1] sm:$0x1] %v18_v4 }

// kernel: moe_layer_forward.2
= control target key start
LH: loop header
LB: loop body
LE: loop exit
PB: predicated region body
PF: predicated region fallthrough
CT: control target
= control target key end

     0   :  { %s1504_s0 = inlined_call_operand.hbm [shape: bf16[16,32], index: 0, kind: input, shape index: {}]   ;;  %s1505_s1 = inlined_call_operand.hbm [shape: f32[2,16], index: 1, kind: input, shape index: {}]   ;;  %s1506_s2 = inlined_call_operand.hbm [shape: bf16[4,32,64], index: 2, kind: input, shape index: {}]   ;;  %s1507_s3 = inlined_call_operand.hbm [shape: f32[4,1,64], index: 3, kind: input, shape index: {}]   ;;  %s1508_s4 = inlined_call_operand.hbm [shape: f32[4,1,64], index: 4, kind: input, shape index: {}]   ;;  %s1509_s5 = inlined_call_operand.hbm [shape: f32[4,2,1], index: 5, kind: output, shape index: {}]  }
   0x1   :  { %1527 = sst [smem:[#allocation20_spill]] %s1504_s0 }
   0x2   :  { %1528 = sst [smem:[#allocation21_spill]] %s1506_s2 }
   0x3   :  { %1529 = sst [smem:[#allocation22_spill]] %s1509_s5 }
   0x4   :  { %10 = vsyncpa [#allocation5], 0 }
   0x5   :  { %11 = vsyncpa [#allocation8], 0 }
   0x6   :  { %12 = vsyncpa [#allocation6], 0 }
   0x7   :  { %14 = vsyncpa [#allocation6 + $0x1], 0  ;;  %s1176_s18 = smov 0   ;;  %s1178_s19 = smov 0  }
   0x8   :  { %s1180_s20 = smov 0   ;;  %s1182_s21 = smov 0  }
   0x9   :  { %s1184_s22 = smov 0   ;;  %s1186_s23 = smov 0  }
   0xa LB: > { %1530 = sst [smem:[#allocation17_spill]] %s1113_s18  ;;  %s1207_s24 = sadd.s32 4294967295, %s1133_s23   ;;  %s1133_s23 = sphi %s1186_s23, %s20_s23   ;;  %s1129_s22 = sphi %s1184_s22, %s1568_s22   ;;  %s1125_s21 = sphi %s1182_s21, %s1567_s21   ;;  %s1121_s20 = sphi %s1180_s20, %s1566_s20   ;;  %s1117_s19 = sphi %s1178_s19, %s1565_s19   ;;  %s1113_s18 = sphi %s1176_s18, %s1564_s18  }
   0xb   : > { %s741_s25 = sadd.s32 4294967294, %s1133_s23   ;;  %p107_p0 = scmp.ne.s32.totalorder %s1121_s20, %s1117_s19 }
   0xc   : > { %p108_p1 = scmp.eq.s32.totalorder %s1133_s23, 0  ;;  %p113_p2 = scmp.ne.s32.totalorder %s1117_s19, %s1113_s18 }
   0xd   : > { %p1510_p3 = scmp.eq.s32.totalorder %s1207_s24, 0  ;;  %p193_p4 = scmp.eq.s32.totalorder %s1207_s24, 3 }
   0xe   : > { %p1218_p5 = por %p108_p1, %p107_p0  ;;  %p199_p6 = scmp.eq.s32.totalorder %s741_s25, 3 }
   0xf   : > { %p1224_p7 = por %p1510_p3, %p113_p2  ;;  %p1228_p8 = por %p193_p4, %p107_p0 }
  0x10   : > { %p1232_p9 = por %p199_p6, %p113_p2  ;;  %p742_p10 = scmp.ge.s32.totalorder %s1133_s23, 1 }
  0x11   : > { %s1532_s28 = scalar_select %p1224_p7, 1, 0 }
  0x12   : > { %s1533_s29 = scalar_select %p1228_p8, 1, 0 }
  0x13   : > { %s1535_s30 = scalar_select %p1232_p9, 1, 0 }
  0x14   : > { %1534 = sst [smem:[#allocation18_spill]] %s1533_s29  ;;  %p206_p11 = scmp.lt.s32.totalorder %s1133_s23, 5 }
  0x15   : > { %1536 = sst [smem:[#allocation19_spill]] %s1535_s30  ;;  %s1135_s7 = smov [#allocation4]  }
  0x16   : > { %p1238_p12 = pnand %p742_p10, %p206_p11  ;;  %s221_s8 = sshll.u32 %s1135_s7, 4  ;;  %s1242_s8 = int_to_ptr.vmem [resolvable:$true] %s221_s8 }
  0x17   : > { %p831_p0 = scmp.lt.s32.totalorder %s1133_s23, 4  ;;  %s39_s11 = sadd.s32 1, %s1129_s22 }
  0x18   : > { %s1537_s6 = scalar_select %p1238_p12, 1, 0 }
  0x19   : > { %p808_p13 = pneg %p1238_p12  ;;  %p1255_p2 = pnand %p831_p0, %p1218_p5 }
  0x1a   : > { %p1260_p4 = scmp.ge.s32.totalorder %s39_s11, 4  ;;  %s1541_s0 = sld [smem:[#allocation20_spill]] }
  0x1b   : > { %p1249_p1 = pnand %p808_p13, %p1510_p3 }
  0x1c   : > { %s1539_s10 = scalar_select %p1255_p2, 1, 0 }
  0x1d   : > { %s1538_s9 = scalar_select %p1249_p1, 1, 0 }
  0x1e   : > { %p1519_p10 = pneg %p1249_p1 }
  0x20   : > { %s897_s15 = scalar_lea.hbm %s1541_s0, 128 }
  0x21   : > { %p898_p6 = scmp.ne.s32.totalorder %s1541_s0, %s897_s15  ;;  %p904_p13 = scmp.lt.u32.totalorder %s897_s15, %s1541_s0 }
  0x23   : > { %p900_p5 = pnand %p1519_p10, %p898_p6 }
  0x25   : > { %p901_p11 = pneg %p900_p5 }
  0x27   : > { %p906_p0 = pnand %p904_p13, %p901_p11 }
  0x29   : > { %909 = shalt.err (!%p906_p0)
}
  0x2a   : > { %s910_s7 = scalar_lea.vmem %s1242_s8, 128  ;;  %p918_p7 = scmp.lt.s32.totalorder %s1242_s8, %s1242_s8 }
  0x2b   : > { %p911_p3 = scmp.ne.s32.totalorder %s1242_s8, %s910_s7  ;;  %p919_p6 = scmp.lt.s32.totalorder %s910_s7, %s910_s7 }
  0x2d   : > { %p913_p9 = pnand %p911_p3, %p1519_p10  ;;  %p920_p5 = por %p919_p6, %p918_p7 }
  0x2f   : > { %p914_p8 = pneg %p913_p9 }
  0x31   : > { %p921_p12 = pnand %p920_p5, %p914_p8 }
  0x33   : > { %924 = shalt.err (!%p921_p12)
}
  0x34   : > { %s1136_s13 = smov 64   ;;  %s1137_s14 = smov 4  }
  0x35   : > { %811 = dma.hbm_to_vmem [thread:$0]  (!%p1249_p1), %s1541_s0, 128, %s1242_s8, [#allocation5], %s1136_s13, %s1136_s13, %s1137_s14  }
  0x36   : > { %s248_s17 = sand.u32 1, %s1133_s23   ;;  %s1570_s11 = smov (%p1260_p4, %s39_s11), 0 }
  0x37   : > { %s1300_s25 = sand.u32 1, %s1121_s20   ;;  %s95_s27 = ssub.s32 %s1129_s22, %s1570_s11 }
  0x38   : > { %s746_s7 = sshll.u32 %s1300_s25, 4  ;;  %p98_p3 = scmp.eq.s32.totalorder %s95_s27, 0 }
  0x39   : > { %s767_s26 = sshll.u32 %s1129_s22, 8  ;;  %s252_s30 = scalar_lea.vmem [#allocation9], %s746_s7 }
  0x3a   : > { %s260_s18 = sshll.u32 %s252_s30, 4  ;;  %s1542_s5 = sadd.s32 1, %s1121_s20  ;;  %s1316_s18 = int_to_ptr.vmem [resolvable:$true] %s260_s18 }
  0x3b   : > { %s1309_s29 = scalar_select %p98_p3, %s1121_s20, %s1542_s5  }
  0x3c   : > { %s1543_s2 = sld [smem:[#allocation21_spill]]  ;;  %s1318_s12 = scalar_lea.sflag [#allocation5], %s248_s17 }
  0x3d   : > { %p1324_p8 = pneg %p1255_p2 }
  0x3f   : > { %s1544_s30 = scalar_select %p1324_p8, 1, 0 }
  0x42   : > { %s1314_s16 = scalar_lea.hbm %s1543_s2, %s767_s26  ;;  %s930_s7 = scalar_lea.hbm %s1543_s2, 1024 }
  0x43   : > { %s925_s27 = scalar_lea.hbm %s1314_s16, 256  ;;  %p931_p4 = scmp.lt.u32.totalorder %s1314_s16, %s1543_s2 }
  0x44   : > { %p926_p7 = scmp.ne.s32.totalorder %s1314_s16, %s925_s27  ;;  %p932_p11 = scmp.lt.u32.totalorder %s930_s7, %s925_s27 }
  0x45   : > { %p934_p0 = scmp.lt.u32.totalorder %s925_s27, %s1314_s16 }
  0x46   : > { %p928_p9 = pnand %p1324_p8, %p926_p7  ;;  %p933_p13 = por %p932_p11, %p931_p4 }
  0x48   : > { %p929_p12 = pneg %p928_p9  ;;  %p935_p6 = por %p934_p0, %p933_p13 }
  0x4a   : > { %p936_p5 = pnand %p935_p6, %p929_p12 }
  0x4c   : > { %939 = shalt.err (!%p936_p5)
}
  0x4d   : > { %s940_s17 = scalar_lea.vmem %s1316_s18, 256  ;;  %s1138_s5 = smov [#allocation9]  }
  0x4e   : > { %p941_p3 = scmp.ne.s32.totalorder %s1316_s18, %s940_s17  ;;  %s945_s26 = sshll.u32 %s1138_s5, 4  ;;  %s946_s26 = int_to_ptr.vmem [resolvable:$false] %s945_s26 }
  0x4f   : > { %s947_s15 = scalar_lea.vmem %s946_s26, 512  ;;  %p948_p10 = scmp.lt.s32.totalorder %s1316_s18, %s946_s26 }
  0x50   : > { %p943_p7 = pnand %p941_p3, %p1324_p8  ;;  %p949_p1 = scmp.lt.s32.totalorder %s947_s15, %s940_s17 }
  0x52   : > { %p944_p9 = pneg %p943_p7  ;;  %p950_p4 = por %p949_p1, %p948_p10 }
  0x54   : > { %p951_p11 = pnand %p950_p4, %p944_p9 }
  0x56   : > { %954 = shalt.err (!%p951_p11)
}
  0x57   : > { %818 = dma.hbm_to_vmem [thread:$0]  (!%p1255_p2), %s1314_s16, 256, %s1316_s18, %s1318_s12, %s1136_s13, %s1136_s13, %s1137_s14  }
  0x58   : > { %s1522_s27 = sshll.u32 %s1129_s22, 4  ;;  %s273_s5 = scalar_lea.vmem [#allocation10], %s1300_s25 }
  0x59   : > { %s1357_s17 = scalar_lea.hbm %s1507_s3, %s1522_s27  ;;  %s281_s26 = sshll.u32 %s273_s5, 4  ;;  %s282_s26 = int_to_ptr.vmem [resolvable:$true] %s281_s26 }
  0x5a   : > { %s955_s15 = scalar_lea.hbm %s1357_s17, 16  ;;  %s960_s14 = scalar_lea.hbm %s1507_s3, 64 }
  0x5b   : > { %p956_p1 = scmp.ne.s32.totalorder %s1357_s17, %s955_s15  ;;  %p961_p13 = scmp.lt.u32.totalorder %s1357_s17, %s1507_s3 }
  0x5c   : > { %p962_p0 = scmp.lt.u32.totalorder %s960_s14, %s955_s15  ;;  %p964_p5 = scmp.lt.u32.totalorder %s955_s15, %s1357_s17 }
  0x5d   : > { %p958_p10 = pnand %p956_p1, %p1324_p8 }
  0x5e   : > { %p963_p6 = por %p962_p0, %p961_p13 }
  0x5f   : > { %p959_p12 = pneg %p958_p10 }
  0x60   : > { %p965_p3 = por %p964_p5, %p963_p6 }
  0x62   : > { %p966_p7 = pnand %p965_p3, %p959_p12 }
  0x64   : > { %969 = shalt.err (!%p966_p7)
}
  0x65   : > { %s970_s8 = scalar_lea.vmem %s282_s26, 16  ;;  %s1139_s5 = smov [#allocation10]  }
  0x66   : > { %p971_p9 = scmp.ne.s32.totalorder %s282_s26, %s970_s8  ;;  %s975_s27 = sshll.u32 %s1139_s5, 4  ;;  %s976_s27 = int_to_ptr.vmem [resolvable:$false] %s975_s27 }
  0x67   : > { %s977_s18 = scalar_lea.vmem %s976_s27, 32  ;;  %p978_p1 = scmp.lt.s32.totalorder %s282_s26, %s976_s27 }
  0x68   : > { %p973_p4 = pnand %p971_p9, %p1324_p8  ;;  %p979_p10 = scmp.lt.s32.totalorder %s977_s18, %s970_s8 }
  0x6a   : > { %p974_p11 = pneg %p973_p4  ;;  %p980_p2 = por %p979_p10, %p978_p1 }
  0x6c   : > { %p981_p0 = pnand %p980_p2, %p974_p11 }
  0x6e   : > { %984 = shalt.err (!%p981_p0)
}
  0x6f   : > { %p1545_p13 = scmp.ne.s32.totalorder %s1539_s10, 0  ;;  %s1140_s15 = smov [#allocation7]  }
  0x70   : > { %s237_s13 = sshll.u32 %s1140_s15, 4  ;;  %s1546_s14 = sshll.u32 %s1129_s22, 4  ;;  %s238_s13 = int_to_ptr.vmem [resolvable:$true] %s237_s13 }
  0x71   : > { %821 = dma.hbm_to_vmem [thread:$0]  (!%p1545_p13), %s1357_s17, 16, %s282_s26, %s1318_s12  }
  0x72   : > { %s1383_s5 = scalar_lea.hbm %s1508_s4, %s1546_s14  ;;  %s985_s18 = scalar_lea.hbm %s1505_s1, 32 }
  0x73   : > { %p986_p2 = scmp.ne.s32.totalorder %s1505_s1, %s985_s18  ;;  %p1547_p12 = scmp.ne.s32.totalorder %s1538_s9, 0 }
  0x74   : > { %p992_p7 = scmp.lt.u32.totalorder %s985_s18, %s1505_s1 }
  0x75   : > { %p1548_p6 = pneg %p1547_p12 }
  0x77   : > { %p988_p5 = pnand %p986_p2, %p1548_p6 }
  0x79   : > { %p989_p3 = pneg %p988_p5 }
  0x7b   : > { %p994_p9 = pnand %p992_p7, %p989_p3 }
  0x7d   : > { %997 = shalt.err (!%p994_p9)
}
  0x7e   : > { %s998_s15 = scalar_lea.vmem %s238_s13, 32  ;;  %p1549_p11 = pmov %p1548_p6 }
  0x7f   : > { %p999_p4 = scmp.ne.s32.totalorder %s238_s13, %s998_s15  ;;  %p1006_p0 = scmp.lt.s32.totalorder %s238_s13, %s238_s13 }
  0x80   : > { %p1007_p13 = scmp.lt.s32.totalorder %s998_s15, %s998_s15 }
  0x81   : > { %p1001_p1 = pnand %p999_p4, %p1549_p11 }
  0x82   : > { %p1008_p8 = por %p1007_p13, %p1006_p0 }
  0x83   : > { %p1002_p10 = pneg %p1001_p1 }
  0x85   : > { %p1009_p2 = pnand %p1008_p8, %p1002_p10 }
  0x87   : > { %1012 = shalt.err (!%p1009_p2)
}
  0x88   : > { %814 = dma.hbm_to_vmem [thread:$0]  (!%p1547_p12), %s1505_s1, 32, %s238_s13, [#allocation8]  }
  0x89   : > { %s291_s14 = scalar_lea.vmem [#allocation11], %s1300_s25  ;;  %s1013_s7 = scalar_lea.hbm %s1383_s5, 16 }
  0x8a   : > { %s299_s16 = sshll.u32 %s291_s14, 4  ;;  %p1014_p6 = scmp.ne.s32.totalorder %s1383_s5, %s1013_s7  ;;  %s300_s16 = int_to_ptr.vmem [resolvable:$true] %s299_s16 }
  0x8b   : > { %p1550_p13 = scmp.ne.s32.totalorder %s1544_s30, 0  ;;  %s1018_s8 = scalar_lea.hbm %s1508_s4, 64 }
  0x8c   : > { %p1019_p3 = scmp.lt.u32.totalorder %s1383_s5, %s1508_s4  ;;  %p1020_p7 = scmp.lt.u32.totalorder %s1018_s8, %s1013_s7 }
  0x8d   : > { %p1016_p8 = pnand %p1014_p6, %p1550_p13  ;;  %p1022_p4 = scmp.lt.u32.totalorder %s1013_s7, %s1383_s5 }
  0x8e   : > { %p1021_p9 = por %p1020_p7, %p1019_p3 }
  0x8f   : > { %p1017_p5 = pneg %p1016_p8 }
  0x90   : > { %p1023_p12 = por %p1022_p4, %p1021_p9 }
  0x92   : > { %p1024_p11 = pnand %p1023_p12, %p1017_p5 }
  0x94   : > { %1027 = shalt.err (!%p1024_p11)
}
  0x95   : > { %s1028_s25 = scalar_lea.vmem %s300_s16, 16  ;;  %s1141_s13 = smov [#allocation11]  }
  0x96   : > { %p1029_p1 = scmp.ne.s32.totalorder %s300_s16, %s1028_s25  ;;  %s1033_s26 = sshll.u32 %s1141_s13, 4  ;;  %s1034_s26 = int_to_ptr.vmem [resolvable:$false] %s1033_s26 }
  0x97   : > { %s1035_s15 = scalar_lea.vmem %s1034_s26, 32  ;;  %p1036_p2 = scmp.lt.s32.totalorder %s300_s16, %s1034_s26 }
  0x98   : > { %p1031_p10 = pnand %p1029_p1, %p1550_p13  ;;  %p1037_p6 = scmp.lt.s32.totalorder %s1035_s15, %s1028_s25 }
  0x9a   : > { %p1032_p0 = pneg %p1031_p10  ;;  %p1038_p8 = por %p1037_p6, %p1036_p2 }
  0x9c   : > { %p1039_p3 = pnand %p1038_p8, %p1032_p0 }
  0x9e   : > { %1042 = shalt.err (!%p1039_p3)
}
  0x9f   : > { %p1551_p7 = scmp.ne.s32.totalorder %s1539_s10, 0  ;;  %p1552_p5 = scmp.ne.s32.totalorder %s1537_s6, 0 }
  0xa0   : > { %p1553_p13 = scmp.eq.s32.totalorder (!%p1552_p5), %s1207_s24, 0 }
  0xa1   : > { %824 = dma.hbm_to_vmem [thread:$0]  (!%p1551_p7), %s1383_s5, 16, %s300_s16, %s1318_s12  }
  0xa2   : > { %308 = sbr.rel (%p1552_p5) target bundleno = 825 (0x339), region = 40 }
  0xa9   : > { %1096 = dma.done.wait (%p1553_p13), [#allocation5], 128   ;;  %p1554_p9 = pmov %p1553_p13 }
  0xab   : > { %1098 = vsyncadd (%p1554_p9), [#allocation5], 4294967168  ;;  %p1555_p4 = pmov %p1554_p9 }
  0xad   : > { %1100 = dma.done.wait (%p1555_p4), [#allocation8], 32   ;;  %p1556_p12 = pmov %p1555_p4 }
  0xae   : > { %s318_s10 = sand.u32 1, %s1207_s24   ;;  %s1436_s12 = sand.u32 1, %s1117_s19  }
  0xaf   : > { %1102 = vsyncadd (%p1556_p12), [#allocation8], 4294967264  ;;  %s754_s6 = sshll.u32 %s1436_s12, 4  ;;  %s319_s30 = scalar_lea.sflag [#allocation5], %s318_s10 }
  0xb0   : > { %s322_s5 = scalar_lea.vmem [#allocation9], %s754_s6  ;;  %p1557_p11 = scmp.ne.s32.totalorder %s1532_s28, 0 }
  0xb2   : > { %1104 = dma.done.wait (%p1557_p11), %s319_s30, 288  }
  0xb3   : > { %1106 = vsyncadd (%p1557_p11), %s319_s30, 4294967008  ;;  %v1142_v0 = vmov 0.0   ;;  %vm1143_vm0 = vmmov 0   ;;  %v890_v1 = vld [vmem:[%s322_s5] sm:$0xff]   ;;  %v891_v2 = vld [vmem:[%s322_s5 + $0x8] sm:$0xff]   ;;  %vm418_vm1 = vcmask 261120  }
  0xb4   : > { %774 = vmatprep.subr.bf16.mxu0 %v1142_v0  ;;  %778 = vmatprep.mubr.msk.bf16.mxu0 %vm1143_vm0, %v1142_v0  ;;  %v892_v3 = vld [vmem:[#allocation4] sm:$0xff]   ;;  %v1144_v4 = vmov 0.0|0.0   ;;  %vm386_vm2 = vcmask 517120   ;;  %s330_s24 = scalar_lea.vmem [#allocation10], %s1436_s12  ;;  %v482_v31 = vld [vmem:[#allocation7] sm:$0x3] }
  0xb5   : > { %786 = vmatprep.mubr.msk.f32.mxu1 %vm1143_vm0, %v1142_v0  ;;  %775 = vmatpush3.bf16.msra.mxu0 %v890_v1  ;;  %387 = vst.msk [vmem:[#allocation2] sm:$0x3] %vm386_vm2, %v1142_v0  ;;  %v756_v5 = vld [vmem:[%s330_s24] ss:$0 sm:$0xff]  ;;  %vm483_vm3 = vcmask 130048   ;;  %vm381_vm4 = vcmask 1024  }
  0xb6   : > { %776 = vmatprep.subr.bf16.mxu0 %v1142_v0  ;;  %789 = vmatprep.subr.bf16.mxu1 %v1144_v4  ;;  %382 = vst.msk [vmem:[#allocation3] sm:$0x3] %vm381_vm4, %v1142_v0  ;;  %s338_s28 = scalar_lea.vmem [#allocation11], %s1436_s12  ;;  %s1558_s0 = sld [smem:[#allocation18_spill]] }
  0xb7   : > { %v762_v36 = vld [vmem:[%s338_s28] ss:$0 sm:$0xff]  ;;  %s755_s2 = sshll.u32 %s1436_s12, 1  ;;  %s764_s14 = sshll.u32 %s1125_s21, 5 }
  0xb8   : > { %s372_s16 = scalar_lea.vmem [#allocation12], %s755_s2  ;;  %s1559_s8 = sld [smem:[#allocation22_spill]] }
  0xb9   : > { %777 = vmatpush3.bf16.msra.mxu0 %v891_v2  ;;  %s598_s7 = sshll.u32 %s372_s16, 4  ;;  %s585_s17 = scalar_lea.sflag [#allocation6], %s1436_s12  ;;  %s1457_s7 = int_to_ptr.vmem [resolvable:$true] %s598_s7 }
  0xba   : > { %s1043_s25 = scalar_lea.vmem %s1457_s7, 32  ;;  %s1145_s21 = smov [#allocation12]  }
  0xbb   : > { %p1044_p1 = scmp.ne.s32.totalorder %s1457_s7, %s1043_s25  ;;  %s1047_s13 = sshll.u32 %s1145_s21, 4  ;;  %s1048_s13 = int_to_ptr.vmem [resolvable:$false] %s1047_s13 }
  0xbc   : > { %779 = vmatmul.mubr.msk.bf16.vlgmr.msra.gmra.mrb[0].mxu0 %vm418_vm1, %v892_v3  ;;  %v481_v32 = vld [vmem:[#allocation2] sm:$0x3]  ;;  %p1560_p10 = scmp.ne.s32.totalorder %s1558_s0, 0  ;;  %s1049_s26 = scalar_lea.vmem %s1048_s13, 64 }
  0xbd   : > { %v563_v40 = vld [vmem:[#allocation3] sm:$0x3]  ;;  %p1050_p6 = scmp.lt.s32.totalorder %s1457_s7, %s1048_s13  ;;  %p1051_p8 = scmp.lt.s32.totalorder %s1049_s26, %s1043_s25 }
  0xbe   : > { %s1455_s18 = scalar_lea.hbm %s1559_s8, %s764_s14  ;;  %p1045_p0 = pnand %p1044_p1, %p1560_p10 }
  0xbf   : > { %p1052_p3 = por %p1051_p8, %p1050_p6 }
  0xc0   : > { %p1046_p2 = pneg %p1045_p0 }
  0xc2   : > { %p1053_p7 = pnand %p1052_p3, %p1046_p2 }
 0x18f   : > { %v456_v6 = vpop.f32.mrb[0].mxu0 }
 0x190   : > { %v457_v7 = vadd.f32 %v756_v5, %v456_v6  ;;  %v780_v8 = vpop.f32.mrb[1].mxu0 }
 0x191   : > { %v459_v9 = vpop.f32.mrb[2].mxu0 }
 0x192   : > { %v465_v10 = vmul.f32 0.044715, %v457_v7  ;;  %v460_v11 = vadd.f32 %v756_v5, %v459_v9  ;;  %v781_v12 = vpop.f32.mrb[3].mxu0  ;;  %v463_v25 = vmul.f32 0.5, %v457_v7 }
 0x194   : > { %v467_v13 = vmul.f32 %v465_v10, %v457_v7  ;;  %v466_v14 = vmul.f32 0.044715, %v460_v11  ;;  %v464_v26 = vmul.f32 0.5, %v460_v11 }
 0x196   : > { %v468_v15 = vmul.f32 %v466_v14, %v460_v11  ;;  %v469_v16 = vmul.f32 %v467_v13, %v457_v7 }
 0x198   : > { %v470_v17 = vmul.f32 %v468_v15, %v460_v11  ;;  %v471_v18 = vadd.f32 %v469_v16, %v457_v7 }
 0x19a   : > { %v472_v19 = vadd.f32 %v470_v17, %v460_v11  ;;  %v473_v20 = vmul.f32 0.7978846, %v471_v18 }
 0x19c   : > { %v474_v21 = vmul.f32 0.7978846, %v472_v19  ;;  %893 = vtanh.f32 %v473_v20 }
 0x19e   : > { %895 = vtanh.f32 %v474_v21 }
 0x1a6   : > { %v894_v22 = vpop.eup %893 }
 0x1a7   : > { %v477_v23 = vadd.f32 1.0, %v894_v22 }
 0x1a8   : > { %v896_v24 = vpop.eup %895 }
 0x1a9   : > { %v478_v27 = vadd.f32 1.0, %v896_v24  ;;  %v479_v28 = vmul.f32 %v477_v23, %v463_v25 }
 0x1ab   : > { %v480_v29 = vmul.f32 %v478_v27, %v464_v26 }
 0x1ad   : > { %v790_v30 = vpack.c.bf16 %v480_v29, %v479_v28 }
 0x1af   : > { %791 = vmatpush3.bf16.msra.mxu1 %v790_v30 }
 0x1b2   : > { %787 = vmatmul.mubr.msk.f32.vlgmr.msra.gmra.mrb[0].mxu1 %vm483_vm3, %v482_v31 }
 0x285   : > { %v553_v33 = vpop.f32.mrb[0].mxu1 }
 0x286   : > { %v557_v34 = vadd.f32 %v553_v33, %v481_v32  ;;  %v788_v35 = vpop.f32.mrb[1].mxu1 }
 0x288   : > { %559 = vst.msk [vmem:[#allocation2] sm:$0x3] %vm386_vm2, %v557_v34 }
 0x28f   : > { %v564_v37 = vld [vmem:[#allocation2] sm:$0x3] }
 0x290   : > { %v572_v38 = vmul.f32 %v762_v36, %v564_v37 }
 0x292   : > { %v573_v39 = vsel %vm386_vm2, %v572_v38, 0.0 }
 0x293   : > { %574 = vadd.xlane.f32.xlu0 %v573_v39 }
 0x320   : > { %v575_v41 = vpop.xlane.xlu0 %574 }
 0x321   : > { %v576_v42 = vadd.f32 %v575_v41, %v563_v40 }
 0x323   : > { %578 = vst.msk [vmem:[#allocation3] sm:$0x3] %vm381_vm4, %v576_v42 }
 0x32a   : > { %v581_v43 = vld [vmem:[#allocation3] sm:$0x3] }
 0x32b   : > { %583 = vst.msk [vmem:[%s372_s16] sm:$0x3] %vm381_vm4, %v581_v43 }
 0x32c   : > { %1056 = shalt.err (!%p1053_p7)
}
 0x32d   : > { %s1057_s15 = scalar_lea.hbm %s1455_s18, 32  ;;  %s1061_s6 = scalar_lea.hbm %s1559_s8, 128 }
 0x32e   : > { %p1058_p5 = scmp.ne.s32.totalorder %s1455_s18, %s1057_s15  ;;  %p1062_p4 = scmp.lt.u32.totalorder %s1455_s18, %s1559_s8 }
 0x32f   : > { %p1063_p12 = scmp.lt.u32.totalorder %s1061_s6, %s1057_s15  ;;  %p1065_p1 = scmp.lt.u32.totalorder %s1057_s15, %s1455_s18 }
 0x330   : > { %p1059_p13 = pnand %p1058_p5, %p1560_p10 }
 0x331   : > { %p1064_p11 = por %p1063_p12, %p1062_p4 }
 0x332   : > { %p1060_p9 = pneg %p1059_p13 }
 0x333   : > { %p1066_p0 = por %p1065_p1, %p1064_p11 }
 0x335   : > { %p1067_p2 = pnand %p1066_p0, %p1060_p9 }
 0x337   : > { %1070 = shalt.err (!%p1067_p2)
}
 0x338   : > { %806 = dma.vmem_to_hbm [thread:$0]  (%p1560_p10), %s1457_s7, 32, %s1455_s18, %s585_s17  }
 0x339 PF: > { %s1561_s24 = sld [smem:[#allocation17_spill]]  ;;  %s1562_s28 = sld [smem:[#allocation19_spill]] }
 0x33a   : > { %p834_p6 = scmp.ge.s32.totalorder %s1133_s23, 2 }
 0x33f   : > { %s610_s2 = sand.u32 1, %s1561_s24   ;;  %p1563_p8 = scmp.ne.s32.totalorder %s1562_s28, 0 }
 0x340   : > { %s611_s14 = scalar_lea.sflag [#allocation6], %s610_s2 }
 0x341   : > { %p826_p3 = pnand %p834_p6, %p1563_p8 }
 0x343   : > { %1108 = dma.done.wait (!%p826_p3), %s611_s14, 32  }
 0x344   : > { %1110 = vsyncadd (!%p826_p3), %s611_s14, 4294967264  ;;  %s20_s23 = sadd.s32 1, %s1133_s23   ;;  %s1564_s18 = smov %s1117_s19 }
 0x345   : > { %p17_p7 = scmp.ge.s32.totalorder %s20_s23, 6   ;;  %s1565_s19 = smov %s1121_s20 }
 0x346   : > { %s1566_s20 = smov %s1309_s29  ;;  %s1567_s21 = smov %s1129_s22 }
 0x347   : > { %s1568_s22 = smov %s1570_s11  ;;  %19 = sbr.rel (!%p17_p7) target bundleno = 10 (0xa), region = 132 }
 0x34e   :  { %616 = vsyncpa [#allocation5], 1 }
 0x34f   :  { %618 = vsyncpa [#allocation5 + $0x1], 1 }
 0x350   :  { %619 = vsyncpa [#allocation8], 1 }
 0x351   :  { %620 = vsyncpa [#allocation6], 1 }
 0x352   :  { %622 = vsyncpa [#allocation6 + $0x1], 1 }

// kernel: moe_layer_forward.3
= control target key start
LH: loop header
LB: loop body
LE: loop exit
PB: predicated region body
PF: predicated region fallthrough
CT: control target
= control target key end

     0   :  { %s2368_s0 = inlined_call_operand.hbm [shape: s32[2], index: 0, kind: input, shape index: {}]   ;;  %s2369_s2 = inlined_call_operand.hbm [shape: bf16[2,8,32], index: 2, kind: input, shape index: {}]   ;;  %s2370_s3 = inlined_call_operand.hbm [shape: bf16[4,32,64], index: 3, kind: input, shape index: {}]   ;;  %s2371_s4 = inlined_call_operand.hbm [shape: f32[4,1,64], index: 4, kind: input, shape index: {}]   ;;  %s2372_s5 = inlined_call_operand.hbm [shape: bf16[4,64,32], index: 5, kind: input, shape index: {}]   ;;  %s2373_s6 = inlined_call_operand.hbm [shape: f32[4,1,32], index: 6, kind: input, shape index: {}]   ;;  %s2374_s7 = inlined_call_operand.hbm [shape: f32[2], index: 7, kind: input, shape index: {}]   ;;  %s2375_s8 = inlined_call_operand.hbm [shape: f32[2,8,32], index: 8, kind: output, shape index: {}]   ;;  %s2376_s1 = inlined_call_operand.hbm [shape: s32[2], index: 1, kind: input, shape index: {}]  }
   0x1   :  { %2410 = sst [smem:[#allocation58_spill]] %s2369_s2  ;;  %s1160_s29 = scalar_lea.hbm %s2368_s0, 16 }
   0x2   :  { %2411 = sst [smem:[#allocation59_spill]] %s2370_s3  ;;  %p1161_p0 = scmp.ne.s32.totalorder %s2368_s0, %s1160_s29 }
   0x3   :  { %2412 = sst [smem:[#allocation60_spill]] %s2371_s4  ;;  %p1164_p1 = scmp.lt.u32.totalorder %s1160_s29, %s2368_s0 }
   0x4   :  { %2413 = sst [smem:[#allocation61_spill]] %s2372_s5 }
   0x5   :  { %2414 = sst [smem:[#allocation62_spill]] %s2373_s6  ;;  %p1166_p2 = pnand %p1164_p1, %p1161_p0 }
   0x6   :  { %2415 = sst [smem:[#allocation63_spill]] %s2374_s7 }
   0x7   :  { %2416 = sst [smem:[#allocation64_spill]] %s2375_s8 }
   0x8   :  { %1169 = shalt.err (!%p1166_p2)  }
   0x9   :  { %s1569_s12 = smov [#allocation4]   ;;  %s1170_s17 = scalar_lea.hbm %s2376_s1, 16 }
   0xa   :  { %14 = dma.hbm_to_smem %s2368_s0, 16, %s1569_s12, [#allocation3] }
   0xb   :  { %p1171_p3 = scmp.ne.s32.totalorder %s2376_s1, %s1170_s17  ;;  %p1174_p4 = scmp.lt.u32.totalorder %s1170_s17, %s2376_s1 }
   0xd   :  { %p1176_p5 = pnand %p1174_p4, %p1171_p3 }
   0xf   :  { %1179 = shalt.err (!%p1176_p5)  }
  0x10   :  { %s1570_s22 = smov [#allocation5]  }
  0x11   :  { %16 = dma.hbm_to_smem %s2376_s1, 16, %s1570_s22, [#allocation3] }
  0x12   :  { %1455 = dma.done.wait [#allocation3], 32 }
  0x13   :  { %1456 = vsyncadd [#allocation3], 4294967264 }
  0x14   :  { %18 = sfence }
  0x15   :  { %19 = vsyncpa [#allocation7], 0 }
  0x16   :  { %21 = vsyncpa [#allocation7 + $0x1], 0 }
  0x17   :  { %22 = vsyncpa [#allocation11], 0 }
  0x18   :  { %24 = vsyncpa [#allocation11 + $0x1], 0 }
  0x19   :  { %25 = vsyncpa [#allocation14], 0 }
  0x1a   :  { %27 = vsyncpa [#allocation14 + $0x1], 0 }
  0x1b   :  { %28 = vsyncpa [#allocation9], 0 }
  0x1c   :  { %29 = vsyncpa [#allocation8], 0 }
  0x1d   :  { %31 = vsyncpa [#allocation8 + $0x1], 0  ;;  %s1651_s0 = smov 0   ;;  %s1653_s25 = smov 0  }
  0x1e   :  { %s1655_s26 = smov 0   ;;  %s1657_s27 = smov 0  }
  0x1f   :  { %s1659_s1 = smov 0   ;;  %s1661_s28 = smov 0  }
  0x20   :  { %s1663_s29 = smov 0   ;;  %s1665_s30 = smov 0  }
  0x21   :  { %s1667_s9 = smov 0   ;;  %s1669_s10 = smov 0  }
  0x22   :  { %s1671_s11 = smov 0   ;;  %s1673_s12 = smov 0  }
  0x23   :  { %s1675_s13 = smov 0   ;;  %s1677_s14 = smov 0  }
  0x24   :  { %s1679_s15 = smov 0   ;;  %s1681_s16 = smov 0  }
  0x25   :  { %s1683_s17 = smov 0   ;;  %s1685_s18 = smov 0  }
  0x26   :  { %s1687_s19 = smov 0   ;;  %s1689_s20 = smov 0  }
  0x27   :  { %s1691_s21 = smov 0  }
  0x28 LB: > { %2417 = sst [smem:[#allocation37_spill]] %s1487_s0  ;;  %s49_s22 = sadd.s32 1, %s1563_s20  ;;  %s1567_s21 = sphi %s1691_s21, %s37_s21   ;;  %s1563_s20 = sphi %s1689_s20, %s2538_s20   ;;  %s1559_s19 = sphi %s1687_s19, %s2537_s19   ;;  %s1555_s18 = sphi %s1685_s18, %s2528_s18   ;;  %s1551_s17 = sphi %s1683_s17, %s2536_s17   ;;  %s1547_s16 = sphi %s1681_s16, %s2535_s16   ;;  %s1543_s15 = sphi %s1679_s15, %s2526_s15   ;;  %s1539_s14 = sphi %s1677_s14, %s2534_s14   ;;  %s1535_s13 = sphi %s1675_s13, %s2533_s13   ;;  %s1531_s12 = sphi %s1673_s12, %s2532_s12   ;;  %s1527_s11 = sphi %s1671_s11, %s2524_s11   ;;  %s1523_s10 = sphi %s1669_s10, %s2523_s10   ;;  %s1519_s9 = sphi %s1667_s9, %s2522_s9   ;;  %s1515_s30 = sphi %s1665_s30, %s2531_s30   ;;  %s1511_s29 = sphi %s1663_s29, %s2530_s29   ;;  %s1507_s28 = sphi %s1661_s28, %s2529_s28   ;;  %s1503_s1 = sphi %s1659_s1, %s2520_s1   ;;  %s1499_s27 = sphi %s1657_s27, %s2519_s27   ;;  %s1495_s26 = sphi %s1655_s26, %s2518_s26   ;;  %s1491_s25 = sphi %s1653_s25, %s2517_s25   ;;  %s1487_s0 = sphi %s1651_s0, %s2516_s0  }
  0x29   : > { %2418 = sst [smem:[#allocation38_spill]] %s1491_s25  ;;  %p2387_p6 = scmp.eq.s32.totalorder %s1567_s21, 0 }
  0x2a   : > { %2419 = sst [smem:[#allocation39_spill]] %s1495_s26  ;;  %p51_p7 = scmp.ge.s32.totalorder %s49_s22, 2 }
  0x2b   : > { %2420 = sst [smem:[#allocation40_spill]] %s1499_s27  ;;  %s88_s24 = sadd.s32 1, %s1543_s15 }
  0x2c   : > { %2421 = sst [smem:[#allocation41_spill]] %s1503_s1  ;;  %p95_p8 = scmp.ne.s32.totalorder %s1543_s15, %s1539_s14 }
  0x2d   : > { %2422 = sst [smem:[#allocation42_spill]] %s1507_s28  ;;  %s2540_s22 = smov (%p51_p7, %s49_s22), 0 }
  0x2e   : > { %2423 = sst [smem:[#allocation43_spill]] %s1519_s9  ;;  %p1766_p9 = por %p95_p8, %p2387_p6 }
  0x2f   : > { %2424 = sst [smem:[#allocation44_spill]] %s1523_s10  ;;  %p2388_p12 = scmp.lt.s32.totalorder %s1567_s21, 2 }
  0x30   : > { %2425 = sst [smem:[#allocation45_spill]] %s1527_s11  ;;  %s292_s4 = sand.u32 1, %s1543_s15  }
  0x31   : > { %2426 = sst [smem:[#allocation46_spill]] %s1531_s12  ;;  %s853_s27 = sshll.u32 %s292_s4, 4 }
  0x32   : > { %2427 = sst [smem:[#allocation47_spill]] %s1543_s15  ;;  %p1781_p13 = pnand %p2388_p12, %p1766_p9 }
  0x33   : > { %2428 = sst [smem:[#allocation48_spill]] %s1547_s16  ;;  %s294_s10 = scalar_lea.vmem [#allocation10], %s853_s27 }
  0x34   : > { %2429 = sst [smem:[#allocation49_spill]] %s1555_s18  ;;  %s303_s6 = sshll.u32 %s294_s10, 4  ;;  %s1787_s6 = int_to_ptr.vmem [resolvable:$true] %s303_s6 }
  0x35   : > { %2430 = sst [smem:[#allocation50_spill]] %s1559_s19  ;;  %p155_p1 = scmp.ne.s32.totalorder %s1519_s9, %s1515_s30 }
  0x36   : > { %s81_s23 = sld [smem:[#allocation5 + %s1563_s20]]  ;;  %p1182_p5 = pneg %p1781_p13 }
  0x37   : > { %s82_s19 = sld [smem:[#allocation5 + %s2540_s22]]  ;;  %p1817_p3 = por %p155_p1, %p2387_p6 }
  0x38   : > { %s916_s1 = scalar_select %p1766_p9, [#allocation5], [#allocation19] }
  0x39   : > { %s917_s4 = scalar_select %p1766_p9, %s1563_s20, 0 }
  0x3a   : > { %s2542_s1 = smov (!%p2388_p12, %s916_s1), [#allocation25]  ;;  %s1800_s16 = sld [smem:[#allocation5 + %s1563_s20]] }
  0x3b   : > { %s2544_s4 = smov (!%p2388_p12, %s917_s4), 0  ;;  %s1803_s27 = sld [smem:[#allocation5 + %s2540_s22]] }
  0x3c   : > { %s295_s11 = sld [smem:[%s2542_s1 + %s2544_s4]] }
  0x3d   : > { %s83_s2 = ssub.s32 %s81_s23, %s82_s19  ;;  %s2434_s3 = sld [smem:[#allocation59_spill]] }
  0x3e   : > { %p86_p0 = scmp.eq.s32.totalorder %s83_s2, 0 }
  0x40   : > { %s1793_s12 = scalar_select %p86_p0, %s1543_s15, %s88_s24  }
  0x41   : > { %s2436_s24 = sand.u32 1, %s1567_s21  }
  0x42   : > { %2433 = sst [smem:[#allocation51_spill]] %s1793_s12  ;;  %s881_s2 = sshll.u32 %s295_s11, 8 }
  0x43   : > { %s1813_s23 = scalar_lea.hbm %s2434_s3, %s881_s2  ;;  %s1823_s4 = scalar_lea.sflag [#allocation11], %s2436_s24 }
  0x44   : > { %s1180_s10 = scalar_lea.hbm %s1813_s23, 256  ;;  %s1185_s19 = scalar_lea.hbm %s2434_s3, 1024 }
  0x45   : > { %p1181_p4 = scmp.ne.s32.totalorder %s1813_s23, %s1180_s10  ;;  %p1186_p9 = scmp.lt.u32.totalorder %s1813_s23, %s2434_s3 }
  0x46   : > { %p1187_p0 = scmp.lt.u32.totalorder %s1185_s19, %s1180_s10  ;;  %p1189_p11 = scmp.lt.u32.totalorder %s1180_s10, %s1813_s23 }
  0x47   : > { %p1183_p7 = pnand %p1182_p5, %p1181_p4 }
  0x48   : > { %p1188_p1 = por %p1187_p0, %p1186_p9 }
  0x49   : > { %p1184_p8 = pneg %p1183_p7 }
  0x4a   : > { %p1190_p6 = por %p1189_p11, %p1188_p1 }
  0x4c   : > { %p1191_p2 = pnand %p1190_p6, %p1184_p8 }
  0x4e   : > { %1194 = shalt.err (!%p1191_p2)
}
  0x4f   : > { %s1195_s24 = scalar_lea.vmem %s1787_s6, 256  ;;  %s1571_s11 = smov [#allocation10]  }
  0x50   : > { %p1196_p4 = scmp.ne.s32.totalorder %s1787_s6, %s1195_s24  ;;  %s1200_s2 = sshll.u32 %s1571_s11, 4  ;;  %s1201_s2 = int_to_ptr.vmem [resolvable:$false] %s1200_s2 }
  0x51   : > { %s1202_s12 = scalar_lea.vmem %s1201_s2, 512  ;;  %p1203_p12 = scmp.lt.s32.totalorder %s1787_s6, %s1201_s2 }
  0x52   : > { %p1198_p7 = pnand %p1196_p4, %p1182_p5  ;;  %p1204_p9 = scmp.lt.s32.totalorder %s1202_s12, %s1195_s24 }
  0x54   : > { %p1199_p10 = pneg %p1198_p7  ;;  %p1205_p0 = por %p1204_p9, %p1203_p12 }
  0x56   : > { %p1206_p11 = pnand %p1205_p0, %p1199_p10 }
  0x58   : > { %1209 = shalt.err (!%p1206_p11)
}
  0x59   : > { %s2389_s10 = smov 64   ;;  %s2390_s19 = smov 4  }
  0x5a   : > { %953 = dma.hbm_to_vmem [thread:$0]  (!%p1781_p13), %s1813_s23, 256, %s1787_s6, %s1823_s4, %s2389_s10, %s2389_s10, %s2390_s19  }
  0x5b   : > { %s334_s8 = sand.u32 1, %s1519_s9   ;;  %p2437_p6 = scmp.lt.s32.totalorder %s1567_s21, 2 }
  0x5c   : > { %s143_s11 = ssub.s32 %s1800_s16, %s1803_s27  ;;  %s857_s2 = sshll.u32 %s334_s8, 5 }
  0x5d   : > { %p1859_p10 = pnand %p2437_p6, %p1817_p3  ;;  %p146_p12 = scmp.eq.s32.totalorder %s143_s11, 0 }
  0x5e   : > { %s922_s28 = scalar_select %p1817_p3, [#allocation5], [#allocation21] }
  0x5f   : > { %s2439_s12 = sadd.s32 1, %s1519_s9  ;;  %p2441_p13 = pmov %p2437_p6 }
  0x60   : > { %s1870_s3 = scalar_select %p146_p12, %s1519_s9, %s2439_s12  }
  0x61   : > { %s923_s6 = scalar_select %p1817_p3, %s1563_s20, 0 }
  0x62   : > { %2440 = sst [smem:[#allocation52_spill]] %s1870_s3  ;;  %s2546_s28 = smov (!%p2441_p13, %s922_s28), [#allocation27] }
  0x63   : > { %p2442_p2 = pmov %p2437_p6  ;;  %s336_s23 = scalar_lea.vmem [#allocation13], %s857_s2 }
  0x64   : > { %s346_s10 = sshll.u32 %s336_s23, 4  ;;  %s1882_s27 = sadd.s32 4294967295, %s1567_s21   ;;  %s1879_s10 = int_to_ptr.vmem [resolvable:$true] %s346_s10 }
  0x65   : > { %s2548_s6 = smov (!%p2442_p2, %s923_s6), 0  ;;  %p2402_p5 = scmp.eq.s32.totalorder %s1882_s27, 0 }
  0x66   : > { %s337_s16 = sld [smem:[%s2546_s28 + %s2548_s6]]  ;;  %s2444_s28 = sand.u32 1, %s1567_s21  }
  0x67   : > { %s2443_s5 = sld [smem:[#allocation61_spill]]  ;;  %s1896_s6 = scalar_lea.sflag [#allocation14], %s2444_s28 }
  0x68   : > { %s1892_s2 = sld [smem:[#allocation4 + %s1563_s20]]  ;;  %p1212_p8 = pneg %p1859_p10 }
  0x6c   : > { %s882_s11 = sshll.u32 %s337_s16, 9 }
  0x6d   : > { %s1889_s19 = scalar_lea.hbm %s2443_s5, %s882_s11  ;;  %s1215_s12 = scalar_lea.hbm %s2443_s5, 2048 }
  0x6e   : > { %s1210_s23 = scalar_lea.hbm %s1889_s19, 512  ;;  %p1216_p7 = scmp.lt.u32.totalorder %s1889_s19, %s2443_s5 }
  0x6f   : > { %p1211_p3 = scmp.ne.s32.totalorder %s1889_s19, %s1210_s23  ;;  %p1217_p9 = scmp.lt.u32.totalorder %s1215_s12, %s1210_s23 }
  0x70   : > { %p1219_p11 = scmp.lt.u32.totalorder %s1210_s23, %s1889_s19 }
  0x71   : > { %p1213_p1 = pnand %p1212_p8, %p1211_p3  ;;  %p1218_p0 = por %p1217_p9, %p1216_p7 }
  0x73   : > { %p1214_p4 = pneg %p1213_p1  ;;  %p1220_p6 = por %p1219_p11, %p1218_p0 }
  0x75   : > { %p1221_p12 = pnand %p1220_p6, %p1214_p4 }
  0x77   : > { %1224 = shalt.err (!%p1221_p12)
}
  0x78   : > { %s1225_s28 = scalar_lea.vmem %s1879_s10, 512  ;;  %s1574_s16 = smov [#allocation13]  }
  0x79   : > { %p1226_p13 = scmp.ne.s32.totalorder %s1879_s10, %s1225_s28  ;;  %s1230_s11 = sshll.u32 %s1574_s16, 4  ;;  %s1231_s11 = int_to_ptr.vmem [resolvable:$false] %s1230_s11 }
  0x7a   : > { %s1232_s8 = scalar_lea.vmem %s1231_s11, 1024  ;;  %p1233_p1 = scmp.lt.s32.totalorder %s1879_s10, %s1231_s11 }
  0x7b   : > { %p1228_p2 = pnand %p1226_p13, %p1212_p8  ;;  %p1234_p7 = scmp.lt.s32.totalorder %s1232_s8, %s1225_s28 }
  0x7d   : > { %p1229_p3 = pneg %p1228_p2  ;;  %p1235_p9 = por %p1234_p7, %p1233_p1 }
  0x7f   : > { %p1236_p0 = pnand %p1235_p9, %p1229_p3 }
  0x81   : > { %1239 = shalt.err (!%p1236_p0)
}
  0x82   : > { %s2445_s23 = smov 4   ;;  %s2446_s12 = smov 64  }
  0x83   : > { %963 = dma.hbm_to_vmem [thread:$0]  (!%p1859_p10), %s1889_s19, 512, %s1879_s10, %s1896_s6, %s2446_s12, %s2446_s12, %s2445_s23  }
  0x84   : > { %p2447_p8 = scmp.ne.s32.totalorder %s1539_s14, %s1535_s13  ;;  %p2450_p11 = scmp.ne.s32.totalorder %s1515_s30, %s1511_s29 }
  0x85   : > { %s221_s28 = sld [smem:[#allocation4 + %s2540_s22]]  ;;  %s225_s16 = sadd.s32 1, %s1495_s26 }
  0x86   : > { %p1932_p4 = por %p2447_p8, %p2402_p5  ;;  %p1941_p6 = por %p2450_p11, %p2402_p5 }
  0x87   : > { %p235_p12 = scmp.ne.s32.totalorder %s1495_s26, %s1491_s25  ;;  %p236_p13 = scmp.eq.s32.totalorder %s1882_s27, 1 }
  0x88   : > { %s2448_s24 = scalar_select %p1932_p4, 1, 0 }
  0x89   : > { %s2451_s1 = scalar_select %p1941_p6, 1, 0 }
  0x8a   : > { %2449 = sst [smem:[#allocation53_spill]] %s2448_s24  ;;  %p241_p2 = scmp.ne.s32.totalorder %s1491_s25, %s1487_s0 }
  0x8b   : > { %s2452_s10 = sadd.s32 4294967294, %s1567_s21   ;;  %p1954_p3 = por %p236_p13, %p235_p12 }
  0x8c   : > { %p242_p10 = scmp.eq.s32.totalorder %s2452_s10, 1  ;;  %p848_p1 = scmp.ge.s32.totalorder %s1567_s21, 1 }
  0x8d   : > { %s2453_s13 = scalar_select %p1954_p3, 1, 0 }
  0x8e   : > { %p1959_p7 = por %p242_p10, %p241_p2  ;;  %p249_p9 = scmp.lt.s32.totalorder %s1567_s21, 3 }
  0x8f   : > { %2454 = sst [smem:[#allocation54_spill]] %s2453_s13  ;;  %s222_s19 = ssub.s32 %s1892_s2, %s221_s28 }
  0x90   : > { %s2455_s29 = scalar_select %p1959_p7, 1, 0 }
  0x91   : > { %p1965_p0 = pnand %p848_p1, %p249_p9  ;;  %p223_p8 = scmp.eq.s32.totalorder %s222_s19, 0 }
  0x92   : > { %2456 = sst [smem:[#allocation55_spill]] %s2455_s29  ;;  %s2459_s7 = sld [smem:[#allocation63_spill]] }
  0x93   : > { %s2457_s11 = scalar_select %p1965_p0, 1, 0 }
  0x94   : > { %p939_p11 = pneg %p1965_p0 }
  0x95   : > { %s1972_s8 = scalar_select %p223_p8, %s1495_s26, %s225_s16  }
  0x96   : > { %p940_p12 = pnand %p939_p11, %p2402_p5 }
  0x97   : > { %2458 = sst [smem:[#allocation56_spill]] %s1972_s8 }
  0x98   : > { %s1240_s10 = scalar_lea.hbm %s2459_s7, 16  ;;  %p1242_p2 = pneg %p940_p12 }
  0x99   : > { %p1241_p13 = scmp.ne.s32.totalorder %s2459_s7, %s1240_s10  ;;  %p1247_p9 = scmp.lt.u32.totalorder %s1240_s10, %s2459_s7 }
  0x9b   : > { %p1243_p10 = pnand %p1242_p2, %p1241_p13 }
  0x9d   : > { %p1244_p1 = pneg %p1243_p10 }
  0x9f   : > { %p1249_p7 = pnand %p1247_p9, %p1244_p1 }
  0xa1   : > { %1252 = shalt.err (!%p1249_p7)
}
  0xa2   : > { %s1575_s16 = smov [#allocation16]   ;;  %s2460_s23 = sld [smem:[#allocation48_spill]] }
  0xa3   : > { %942 = dma.hbm_to_smem (!%p940_p12), %s2459_s7, 16, %s1575_s16, [#allocation9]  }
  0xa4   : > { %s53_s5 = sld [smem:[#allocation4 + %s1563_s20]]  ;;  %p65_p7 = scmp.ne.s32.totalorder %s1555_s18, %s1551_s17 }
  0xa5   : > { %s54_s15 = sld [smem:[#allocation4 + %s2540_s22]]  ;;  %s271_s3 = sand.u32 1, %s1555_s18  }
  0xa6   : > { %s58_s12 = sadd.s32 1, %s1555_s18  ;;  %p2461_p11 = scmp.eq.s32.totalorder %s1567_s21, 0 }
  0xa7   : > { %s2463_s2 = sld [smem:[#allocation45_spill]]  ;;  %s2464_s28 = sld [smem:[#allocation46_spill]] }
  0xa8   : > { %p71_p8 = scmp.ne.s32.totalorder %s1551_s17, %s2460_s23  ;;  %p67_p13 = por %p2461_p11, %p65_p7 }
  0xa9   : > { %s851_s16 = sshll.u32 %s271_s3, 2  ;;  %s2465_s19 = sld [smem:[#allocation44_spill]] }
  0xaa   : > { %p2000_p2 = por %p2402_p5, %p71_p8  ;;  %p2466_p12 = scmp.lt.s32.totalorder %s1567_s21, 2 }
  0xab   : > { %s55_s7 = ssub.s32 %s53_s5, %s54_s15  ;;  %s275_s9 = scalar_lea.vmem [#allocation6], %s851_s16 }
  0xac   : > { %s2462_s10 = scalar_select %p2000_p2, 1, 0 }
  0xad   : > { %p2006_p10 = pnand %p2466_p12, %p67_p13  ;;  %p56_p1 = scmp.eq.s32.totalorder %s55_s7, 0 }
  0xae   : > { %s283_s8 = sshll.u32 %s275_s9, 4  ;;  %p2469_p9 = pmov %p2466_p12  ;;  %s2024_s8 = int_to_ptr.vmem [resolvable:$true] %s283_s8 }
  0xaf   : > { %s913_s26 = scalar_select %p67_p13, [#allocation4], [#allocation18] }
  0xb0   : > { %s2011_s29 = scalar_select %p56_p1, %s1555_s18, %s58_s12  }
  0xb1   : > { %s914_s0 = scalar_select %p67_p13, %s1563_s20, 0 }
  0xb2   : > { %2468 = sst [smem:[#allocation57_spill]] %s2011_s29  ;;  %s2550_s26 = smov (!%p2469_p9, %s913_s26), [#allocation24] }
  0xb3   : > { %p2470_p7 = pmov %p2469_p9  ;;  %s2019_s15 = sld [smem:[#allocation5 + %s1563_s20]] }
  0xb4   : > { %s2022_s25 = sld [smem:[#allocation5 + %s2540_s22]]  ;;  %p125_p8 = scmp.ne.s32.totalorder %s2464_s28, %s2463_s2 }
  0xb5   : > { %s2552_s0 = smov (!%p2470_p7, %s914_s0), 0  ;;  %p131_p11 = scmp.ne.s32.totalorder %s2463_s2, %s2465_s19 }
  0xb6   : > { %s276_s5 = sld [smem:[%s2550_s26 + %s2552_s0]]  ;;  %s315_s7 = sand.u32 1, %s2464_s28  }
  0xb7   : > { %p2471_p12 = scmp.eq.s32.totalorder %s1567_s21, 0  ;;  %s2473_s18 = sld [smem:[#allocation58_spill]] }
  0xb8   : > { %p2044_p13 = por %p131_p11, %p2402_p5  ;;  %s272_s26 = scalar_lea.sflag [#allocation7], %s271_s3 }
  0xb9   : > { %p2033_p1 = por %p125_p8, %p2471_p12  ;;  %p1255_p7 = pneg %p2006_p10 }
  0xba   : > { %s2475_s0 = scalar_select %p2044_p13, 1, 0 }
  0xbc   : > { %s852_s9 = sshll.u32 %s276_s5, 6 }
  0xbd   : > { %s2474_s24 = smov %s2473_s18  ;;  %s2040_s13 = scalar_lea.hbm %s2473_s18, %s852_s9 }
  0xbe   : > { %s1253_s2 = scalar_lea.hbm %s2040_s13, 64  ;;  %s1258_s19 = scalar_lea.hbm %s2474_s24, 128 }
  0xbf   : > { %p1254_p9 = scmp.ne.s32.totalorder %s2040_s13, %s1253_s2  ;;  %p1259_p11 = scmp.lt.u32.totalorder %s2040_s13, %s2474_s24 }
  0xc0   : > { %p1260_p5 = scmp.lt.u32.totalorder %s1258_s19, %s1253_s2  ;;  %p1262_p6 = scmp.lt.u32.totalorder %s1253_s2, %s2040_s13 }
  0xc1   : > { %p1256_p8 = pnand %p1255_p7, %p1254_p9 }
  0xc2   : > { %p1261_p3 = por %p1260_p5, %p1259_p11 }
  0xc3   : > { %p1257_p12 = pneg %p1256_p8 }
  0xc4   : > { %p1263_p13 = por %p1262_p6, %p1261_p3 }
  0xc6   : > { %p1264_p4 = pnand %p1263_p13, %p1257_p12 }
  0xc8   : > { %1267 = shalt.err (!%p1264_p4)
}
  0xc9   : > { %s1268_s3 = scalar_lea.vmem %s2024_s8, 64  ;;  %s1576_s16 = smov [#allocation6]  }
  0xca   : > { %p1269_p9 = scmp.ne.s32.totalorder %s2024_s8, %s1268_s3  ;;  %s1273_s18 = sshll.u32 %s1576_s16, 4  ;;  %s1274_s18 = int_to_ptr.vmem [resolvable:$false] %s1273_s18 }
  0xcb   : > { %s1275_s29 = scalar_lea.vmem %s1274_s18, 128  ;;  %p1276_p0 = scmp.lt.s32.totalorder %s2024_s8, %s1274_s18 }
  0xcc   : > { %p1271_p8 = pnand %p1269_p9, %p1255_p7  ;;  %p1277_p5 = scmp.lt.s32.totalorder %s1275_s29, %s1268_s3 }
  0xce   : > { %p1272_p2 = pneg %p1271_p8  ;;  %p1278_p11 = por %p1277_p5, %p1276_p0 }
  0xd0   : > { %p1279_p6 = pnand %p1278_p11, %p1272_p2 }
  0xd2   : > { %1282 = shalt.err (!%p1279_p6)
}
  0xd3   : > { %948 = dma.hbm_to_vmem [thread:$0]  (!%p2006_p10), %s2040_s13, 64, %s2024_s8, %s272_s26  }
  0xd4   : > { %s2476_s2 = sld [smem:[#allocation41_spill]]  ;;  %s2477_s19 = sld [smem:[#allocation42_spill]] }
  0xd5   : > { %s113_s23 = ssub.s32 %s2019_s15, %s2022_s25  ;;  %s118_s5 = sadd.s32 1, %s2464_s28 }
  0xd6   : > { %s2478_s9 = sld [smem:[#allocation40_spill]]  ;;  %p116_p4 = scmp.eq.s32.totalorder %s113_s23, 0 }
  0xd7   : > { %s919_s3 = scalar_select %p2033_p1, [#allocation5], [#allocation20] }
  0xd8   : > { %s2079_s16 = scalar_select %p116_p4, %s2464_s28, %s118_s5  }
  0xd9   : > { %s920_s18 = scalar_select %p2033_p1, %s1563_s20, 0 }
  0xda   : > { %p2479_p3 = scmp.lt.s32.totalorder %s1567_s21, 2  ;;  %s316_s13 = scalar_lea.vmem [#allocation12], %s315_s7 }
  0xdb   : > { %s325_s8 = sshll.u32 %s316_s13, 4  ;;  %s2099_s26 = sld [smem:[#allocation5 + %s1563_s20]]  ;;  %s2104_s8 = int_to_ptr.vmem [resolvable:$true] %s325_s8 }
  0xdc   : > { %s2554_s3 = smov (!%p2479_p3, %s919_s3), [#allocation26]  ;;  %p2480_p0 = pmov %p2479_p3 }
  0xdd   : > { %s2102_s29 = sld [smem:[#allocation5 + %s2540_s22]]  ;;  %p183_p13 = scmp.ne.s32.totalorder %s2477_s19, %s2476_s2 }
  0xde   : > { %s2556_s18 = smov (!%p2480_p0, %s920_s18), 0  ;;  %p2481_p2 = pmov %p2480_p0 }
  0xdf   : > { %s317_s15 = sld [smem:[%s2554_s3 + %s2556_s18]] }
  0xe0   : > { %p2094_p10 = pnand %p2481_p2, %p2033_p1  ;;  %s2483_s12 = sld [smem:[#allocation60_spill]] }
  0xe1   : > { %p2485_p1 = scmp.eq.s32.totalorder %s1567_s21, 0 }
  0xe2   : > { %p1285_p8 = pneg %p2094_p10 }
  0xe3   : > { %p2117_p12 = por %p183_p13, %p2485_p1 }
  0xe5   : > { %s856_s23 = sshll.u32 %s317_s15, 4 }
  0xe6   : > { %s2484_s5 = smov %s2483_s12  ;;  %s2113_s13 = scalar_lea.hbm %s2483_s12, %s856_s23 }
  0xe7   : > { %s1283_s18 = scalar_lea.hbm %s2113_s13, 16  ;;  %s1288_s28 = scalar_lea.hbm %s2484_s5, 64 }
  0xe8   : > { %p1284_p9 = scmp.ne.s32.totalorder %s2113_s13, %s1283_s18  ;;  %p1289_p6 = scmp.lt.u32.totalorder %s2113_s13, %s2484_s5 }
  0xe9   : > { %p1290_p4 = scmp.lt.u32.totalorder %s1288_s28, %s1283_s18  ;;  %p1292_p0 = scmp.lt.u32.totalorder %s1283_s18, %s2113_s13 }
  0xea   : > { %p1286_p5 = pnand %p1285_p8, %p1284_p9 }
  0xeb   : > { %p1291_p3 = por %p1290_p4, %p1289_p6 }
  0xec   : > { %p1287_p11 = pneg %p1286_p5 }
  0xed   : > { %p1293_p2 = por %p1292_p0, %p1291_p3 }
  0xef   : > { %p1294_p13 = pnand %p1293_p2, %p1287_p11 }
  0xf1   : > { %1297 = shalt.err (!%p1294_p13)
}
  0xf2   : > { %s1298_s24 = scalar_lea.vmem %s2104_s8, 16  ;;  %s1577_s15 = smov [#allocation12]  }
  0xf3   : > { %p1299_p1 = scmp.ne.s32.totalorder %s2104_s8, %s1298_s24  ;;  %s1303_s23 = sshll.u32 %s1577_s15, 4  ;;  %s1304_s23 = int_to_ptr.vmem [resolvable:$false] %s1303_s23 }
  0xf4   : > { %s1305_s7 = scalar_lea.vmem %s1304_s23, 32  ;;  %p1306_p7 = scmp.lt.s32.totalorder %s2104_s8, %s1304_s23 }
  0xf5   : > { %p1301_p9 = pnand %p1299_p1, %p1285_p8  ;;  %p1307_p6 = scmp.lt.s32.totalorder %s1305_s7, %s1298_s24 }
  0xf7   : > { %p1302_p5 = pneg %p1301_p9  ;;  %p1308_p4 = por %p1307_p6, %p1306_p7 }
  0xf9   : > { %p1309_p3 = pnand %p1308_p4, %p1302_p5 }
  0xfb   : > { %1312 = shalt.err (!%p1309_p3)
}
  0xfc   : > { %958 = dma.hbm_to_vmem [thread:$0]  (!%p2094_p10), %s2113_s13, 16, %s2104_s8, %s1823_s4  }
  0xfd   : > { %p2487_p7 = scmp.eq.s32.totalorder %s1882_s27, 0  ;;  %p2488_p8 = scmp.ne.s32.totalorder %s2476_s2, %s2478_s9 }
  0xfe   : > { %s173_s25 = ssub.s32 %s2099_s26, %s2102_s29  ;;  %s176_s18 = sadd.s32 1, %s2477_s19 }
  0xff   : > { %p2152_p11 = por %p2488_p8, %p2487_p7  ;;  %p174_p0 = scmp.eq.s32.totalorder %s173_s25, 0 }
 0x100   : > { %s358_s28 = sand.u32 1, %s2477_s19   ;;  %p2490_p2 = scmp.lt.s32.totalorder %s1567_s21, 2 }
 0x101   : > { %s925_s12 = scalar_select %p2117_p12, [#allocation5], [#allocation22] }
 0x102   : > { %s2558_s19 = smov (!%p174_p0, %s2477_s19), %s176_s18  ;;  %p2491_p13 = pmov %p2490_p2 }
 0x103   : > { %s926_s15 = scalar_select %p2117_p12, %s1563_s20, 0 }
 0x104   : > { %s2560_s12 = smov (!%p2490_p2, %s925_s12), [#allocation28]  ;;  %p2492_p10 = pmov %p2490_p2 }
 0x105   : > { %s2562_s15 = smov (!%p2491_p13, %s926_s15), 0  ;;  %s359_s9 = scalar_lea.vmem [#allocation15], %s358_s28 }
 0x106   : > { %p2176_p1 = pnand %p2492_p10, %p2117_p12  ;;  %s360_s2 = sld [smem:[%s2560_s12 + %s2562_s15]] }
 0x107   : > { %s367_s8 = sshll.u32 %s359_s9, 4  ;;  %s2494_s23 = sld [smem:[#allocation62_spill]]  ;;  %s2180_s8 = int_to_ptr.vmem [resolvable:$true] %s367_s8 }
 0x108   : > { %p1315_p5 = pneg %p2176_p1 }
 0x10c   : > { %s860_s26 = sshll.u32 %s360_s2, 4 }
 0x10d   : > { %s365_s7 = scalar_lea.hbm %s2494_s23, %s860_s26  ;;  %s1318_s28 = scalar_lea.hbm %s2494_s23, 64 }
 0x10e   : > { %s1313_s25 = scalar_lea.hbm %s365_s7, 16  ;;  %p1319_p4 = scmp.lt.u32.totalorder %s365_s7, %s2494_s23 }
 0x10f   : > { %p1314_p9 = scmp.ne.s32.totalorder %s365_s7, %s1313_s25  ;;  %p1320_p3 = scmp.lt.u32.totalorder %s1318_s28, %s1313_s25 }
 0x110   : > { %p1322_p8 = scmp.lt.u32.totalorder %s1313_s25, %s365_s7 }
 0x111   : > { %p1316_p12 = pnand %p1315_p5, %p1314_p9  ;;  %p1321_p7 = por %p1320_p3, %p1319_p4 }
 0x113   : > { %p1317_p6 = pneg %p1316_p12  ;;  %p1323_p0 = por %p1322_p8, %p1321_p7 }
 0x115   : > { %p1324_p2 = pnand %p1323_p0, %p1317_p6 }
 0x117   : > { %1327 = shalt.err (!%p1324_p2)
}
 0x118   : > { %s1328_s2 = scalar_lea.vmem %s2180_s8, 16  ;;  %s1578_s9 = smov [#allocation15]  }
 0x119   : > { %p1329_p13 = scmp.ne.s32.totalorder %s2180_s8, %s1328_s2  ;;  %s1333_s26 = sshll.u32 %s1578_s9, 4  ;;  %s1334_s26 = int_to_ptr.vmem [resolvable:$false] %s1333_s26 }
 0x11a   : > { %s1335_s29 = scalar_lea.vmem %s1334_s26, 32  ;;  %p1336_p12 = scmp.lt.s32.totalorder %s2180_s8, %s1334_s26 }
 0x11b   : > { %p1331_p10 = pnand %p1329_p13, %p1315_p5  ;;  %p1337_p4 = scmp.lt.s32.totalorder %s1335_s29, %s1328_s2 }
 0x11d   : > { %p1332_p9 = pneg %p1331_p10  ;;  %p1338_p3 = por %p1337_p4, %p1336_p12 }
 0x11f   : > { %p1339_p7 = pnand %p1338_p3, %p1332_p9 }
 0x121   : > { %1342 = shalt.err (!%p1339_p7)
}
 0x122   : > { %968 = dma.hbm_to_vmem [thread:$0]  (!%p2176_p1), %s365_s7, 16, %s2180_s8, %s1896_s6  }
 0x123   : > { %p2495_p6 = scmp.ne.s32.totalorder %s2457_s11, 0 }
 0x124   : > { %s378_s13 = sand.u32 (!%p2495_p6), 1, %s1551_s17   ;;  %p2496_p5 = scmp.ne.s32.totalorder (!%p2495_p6), %s2462_s10, 0 }
 0x125   : > { %376 = sbr.rel (%p2495_p6) target bundleno = 828 (0x33c), region = 44  ;;  %s2209_s25 = sshll.u32 (!%p2495_p6), %s378_s13, 2 }
 0x126   : > { %s379_s3 = scalar_lea.sflag (!%p2495_p6), [#allocation7], %s378_s13  ;;  %s382_s18 = scalar_lea.vmem (!%p2495_p6), [#allocation6], %s2209_s25 }
 0x12c   : > { %1458 = dma.done.wait (%p2496_p5), %s379_s3, 64  }
 0x12d   : > { %1460 = vsyncadd (%p2496_p5), %s379_s3, 4294967232  ;;  %s2497_s4 = sld [smem:[#allocation53_spill]]  ;;  %s387_s6 = sand.u32 1, %s1882_s27  }
 0x12e   : > { %s389_s8 = sand.u32 1, %s1539_s14   ;;  %s388_s7 = scalar_lea.sflag [#allocation11], %s387_s6 }
 0x12f   : > { %s863_s11 = sshll.u32 %s389_s8, 4 }
 0x130   : > { %s391_s28 = scalar_lea.vmem [#allocation10], %s863_s11 }
 0x133   : > { %p2498_p1 = scmp.ne.s32.totalorder %s2497_s4, 0 }
 0x135   : > { %1462 = dma.done.wait (%p2498_p1), %s388_s7, 256  }
 0x136   : > { %1464 = vsyncadd (%p2498_p1), %s388_s7, 4294967040  ;;  %s2499_s12 = sld [smem:[#allocation45_spill]]  ;;  %p2500_p8 = scmp.ne.s32.totalorder %s2475_s0, 0 }
 0x13c   : > { %s398_s15 = sand.u32 1, %s2499_s12  }
 0x13d   : > { %s2223_s2 = scalar_lea.vmem [#allocation12], %s398_s15 }
 0x13e   : > { %1466 = dma.done.wait (%p2500_p8), %s388_s7, 16  }
 0x13f   : > { %1468 = vsyncadd (%p2500_p8), %s388_s7, 4294967280  ;;  %s406_s10 = sand.u32 1, %s1515_s30   ;;  %s405_s26 = scalar_lea.sflag [#allocation14], %s387_s6 }
 0x140   : > { %s864_s9 = sshll.u32 %s406_s10, 5  ;;  %p2501_p0 = scmp.ne.s32.totalorder %s2451_s1, 0 }
 0x141   : > { %s2230_s29 = scalar_lea.vmem [#allocation13], %s864_s9 }
 0x142   : > { %1470 = dma.done.wait (%p2501_p0), %s405_s26, 512  }
 0x143   : > { %1472 = vsyncadd (%p2501_p0), %s405_s26, 4294966784  ;;  %s2502_s13 = sld [smem:[#allocation41_spill]] }
 0x149   : > { %s415_s3 = sand.u32 1, %s2502_s13  }
 0x14a   : > { %s2237_s4 = scalar_lea.vmem [#allocation15], %s415_s3 }
 0x14b   : > { %1474 = dma.done.wait (%p2152_p11), %s405_s26, 16  }
 0x14c   : > { %1476 = vsyncadd (%p2152_p11), %s405_s26, 4294967280  ;;  %p2503_p2 = scmp.eq.s32.totalorder %s1882_s27, 0 }
 0x14e   : > { %1478 = dma.done.wait (%p2503_p2), [#allocation9], 16   ;;  %p2504_p13 = pmov %p2503_p2 }
 0x150   : > { %1480 = vsyncadd (%p2504_p13), [#allocation9], 4294967280 }
 0x151   : > { %425 = sfence }
 0x152   : > { %v1152_v0 = vld [vmem:[%s391_s28] sm:$0xff]   ;;  %v1579_v1 = vmov 0.0   ;;  %v1153_v2 = vld [vmem:[%s391_s28 + $0x8] sm:$0xff]   ;;  %vm1580_vm0 = vmmov 0   ;;  %vm480_vm1 = vcmask 261120   ;;  %s2505_s27 = sld [smem:[#allocation54_spill]] }
 0x153   : > { %891 = vmatprep.subr.bf16.mxu0 %v1579_v1  ;;  %899 = vmatprep.subr.bf16.mxu1 %v1579_v1  ;;  %481 = vst.msk [vmem:[#allocation2] sm:$0xff] %vm480_vm1, %v1579_v1  ;;  %v482_v3 = vld [vmem:[%s382_s18] sm:$0xf]  ;;  %v1154_v4 = vld [vmem:[%s2230_s29] sm:$0xff]   ;;  %v1155_v5 = vld [vmem:[%s2230_s29 + $0x8] sm:$0xff]   ;;  %s2506_s1 = sld [smem:[#allocation50_spill]] }
 0x154   : > { %892 = vmatpush3.bf16.msra.mxu0 %v1152_v0  ;;  %895 = vmatprep.mubr.msk.bf16.mxu0 %vm1580_vm0, %v1579_v1  ;;  %v1156_v6 = vld [vmem:[%s2230_s29 + $0x10] sm:$0xff]   ;;  %v1157_v7 = vld [vmem:[%s2230_s29 + $0x18] sm:$0xff]   ;;  %v867_v8 = vld [vmem:[%s2223_s2] ss:$0 sm:$0xff]  ;;  %s2507_s0 = sld [smem:[#allocation38_spill]]  ;;  %vm593_vm2 = vcmask 523264  }
 0x155   : > { %893 = vmatprep.subr.bf16.mxu0 %v1579_v1  ;;  %907 = vmatprep.mubr.msk.bf16.mxu1 %vm1580_vm0, %v1579_v1  ;;  %v876_v30 = vld [vmem:[%s2237_s4] ss:$0 sm:$0xff]  ;;  %s2509_s10 = sld [smem:[#allocation64_spill]]  ;;  %s1581_s13 = smov [#allocation17]  }
 0x156   : > { %900 = vmatpush3.bf16.msra.mxu1 %v1154_v4  ;;  %s1347_s4 = sshll.u32 %s1581_s13, 4  ;;  %s1348_s4 = int_to_ptr.vmem [resolvable:$false] %s1347_s4 }
 0x157   : > { %901 = vmatprep.subr.bf16.mxu1 %v1579_v1 }
 0x158   : > { %894 = vmatpush3.bf16.msra.mxu0 %v1153_v2  ;;  %p2508_p11 = scmp.ne.s32.totalorder %s2505_s27, 0 }
 0x159   : > { %s642_s6 = sld [smem:[#allocation16 + %s2506_s1]] }
 0x15a   : > { %902 = vmatpush3.bf16.msra.mxu1 %v1155_v5  ;;  %s935_s24 = scalar_select %p2508_p11, [#allocation4], [#allocation23]  ;;  %v559_v24 = vld [vmem:[#allocation2] sm:$0xff] }
 0x15b   : > { %896 = vmatmul.mubr.msk.bf16.vlgmr.msra.gmra.mrb[0].mxu0 %vm480_vm1, %v482_v3  ;;  %903 = vmatprep.subr.bf16.mxu1 %v1579_v1  ;;  %s936_s25 = scalar_select %p2508_p11, %s2506_s1, 0 }
 0x15c   : > { %s465_s18 = sand.u32 1, %s2507_s0   ;;  %s2510_s3 = smov %s2509_s10 }
 0x15d   : > { %s663_s8 = sld [smem:[%s935_s24 + %s936_s25]]  ;;  %s866_s11 = sshll.u32 %s465_s18, 3 }
 0x15e   : > { %904 = vmatpush3.bf16.msra.mxu1 %v1156_v6  ;;  %s467_s28 = scalar_lea.vmem [#allocation17], %s866_s11  ;;  %s656_s26 = scalar_lea.sflag [#allocation8], %s465_s18 }
 0x15f   : > { %905 = vmatprep.subr.bf16.mxu1 %v1579_v1  ;;  %v652_v32 = vstv %s642_s6  ;;  %s670_s12 = sshll.u32 %s467_s28, 4  ;;  %s1349_s1 = scalar_lea.vmem %s1348_s4, 256  ;;  %s2270_s12 = int_to_ptr.vmem [resolvable:$true] %s670_s12 }
 0x160   : > { %s1343_s29 = scalar_lea.vmem %s2270_s12, 128  ;;  %p1350_p4 = scmp.lt.s32.totalorder %s2270_s12, %s1348_s4 }
 0x161   : > { %p1344_p10 = scmp.ne.s32.totalorder %s2270_s12, %s1343_s29  ;;  %p1351_p3 = scmp.lt.s32.totalorder %s1349_s1, %s1343_s29 }
 0x162   : > { %906 = vmatpush3.bf16.msra.mxu1 %v1157_v7 }
 0x163   : > { %s878_s7 = sshll.u32 %s663_s8, 7  ;;  %p1345_p9 = pnand %p1344_p10, %p2508_p11 }
 0x164   : > { %s2268_s9 = scalar_lea.hbm %s2509_s10, %s878_s7  ;;  %p1352_p7 = por %p1351_p3, %p1350_p4 }
 0x165   : > { %p1346_p12 = pneg %p1345_p9 }
 0x167   : > { %p1353_p6 = pnand %p1352_p7, %p1346_p12 }
 0x22e   : > { %v544_v9 = vpop.f32.mrb[0].mxu0 }
 0x22f   : > { %v545_v10 = vadd.f32 %v867_v8, %v544_v9  ;;  %v897_v11 = vpop.f32.mrb[1].mxu0 }
 0x230   : > { %v547_v12 = vpop.f32.mrb[2].mxu0 }
 0x231   : > { %v551_v13 = vmul.f32 0.044715, %v545_v10  ;;  %v898_v14 = vpop.f32.mrb[3].mxu0  ;;  %v550_v20 = vmul.f32 0.5, %v545_v10 }
 0x233   : > { %v552_v15 = vmul.f32 %v551_v13, %v545_v10 }
 0x235   : > { %v553_v16 = vmul.f32 %v552_v15, %v545_v10 }
 0x237   : > { %v554_v17 = vadd.f32 %v553_v16, %v545_v10 }
 0x239   : > { %v555_v18 = vmul.f32 0.7978846, %v554_v17 }
 0x23b   : > { %1158 = vtanh.f32 %v555_v18 }
 0x245   : > { %v1159_v19 = vpop.eup %1158 }
 0x246   : > { %v557_v21 = vadd.f32 1.0, %v1159_v19 }
 0x248   : > { %v558_v22 = vmul.f32 %v557_v21, %v550_v20 }
 0x24a   : > { %v560_v23 = vpack.c.bf16 %v558_v22, %v558_v22 }
 0x24c   : > { %908 = vmatmul.mubr.msk.bf16.vlgmr.msra.gmra.mrb[0].mxu1 %vm593_vm2, %v560_v23 }
 0x31f   : > { %v631_v25 = vpop.f32.mrb[0].mxu1 }
 0x320   : > { %v637_v26 = vadd.f32 %v631_v25, %v559_v24  ;;  %v909_v27 = vpop.f32.mrb[1].mxu1 }
 0x321   : > { %v634_v28 = vpop.f32.mrb[2].mxu1 }
 0x322   : > { %638 = vst.msk [vmem:[#allocation2] sm:$0xff] %vm480_vm1, %v637_v26  ;;  %v910_v29 = vpop.f32.mrb[3].mxu1 }
 0x329   : > { %v643_v31 = vld [vmem:[#allocation2] sm:$0xff] }
 0x32a   : > { %v651_v33 = vadd.f32 %v876_v30, %v643_v31 }
 0x32c   : > { %v653_v34 = vmul.f32 %v652_v32, %v651_v33 }
 0x32e   : > { %654 = vst.msk [vmem:[%s467_s28] sm:$0xff] %vm480_vm1, %v653_v34 }
 0x32f   : > { %1356 = shalt.err (!%p1353_p6)
}
 0x330   : > { %s1357_s0 = scalar_lea.hbm %s2268_s9, 128  ;;  %s1361_s18 = scalar_lea.hbm %s2510_s3, 256 }
 0x331   : > { %p1358_p5 = scmp.ne.s32.totalorder %s2268_s9, %s1357_s0  ;;  %p1362_p0 = scmp.lt.u32.totalorder %s2268_s9, %s2510_s3 }
 0x332   : > { %p1363_p2 = scmp.lt.u32.totalorder %s1361_s18, %s1357_s0  ;;  %p1365_p10 = scmp.lt.u32.totalorder %s1357_s0, %s2268_s9 }
 0x333   : > { %p1359_p1 = pnand %p1358_p5, %p2508_p11 }
 0x334   : > { %p1364_p13 = por %p1363_p2, %p1362_p0 }
 0x335   : > { %p1360_p8 = pneg %p1359_p1 }
 0x336   : > { %p1366_p9 = por %p1365_p10, %p1364_p13 }
 0x338   : > { %p1367_p12 = pnand %p1366_p9, %p1360_p8 }
 0x33a   : > { %1370 = shalt.err (!%p1367_p12)
}
 0x33b   : > { %937 = dma.vmem_to_hbm [thread:$0]  (%p2508_p11), %s2270_s12, 128, %s2268_s9, %s656_s26  }
 0x33c PF: > { %s2511_s11 = sld [smem:[#allocation37_spill]]  ;;  %s2512_s7 = sld [smem:[#allocation55_spill]] }
 0x33d   : > { %p2514_p3 = scmp.ge.s32.totalorder %s1567_s21, 2 }
 0x342   : > { %s682_s28 = sand.u32 1, %s2511_s11   ;;  %p2513_p4 = scmp.ne.s32.totalorder %s2512_s7, 0 }
 0x343   : > { %s683_s15 = scalar_lea.sflag [#allocation8], %s682_s28 }
 0x344   : > { %p970_p7 = pnand %p2514_p3, %p2513_p4 }
 0x346   : > { %1482 = dma.done.wait (!%p970_p7), %s683_s15, 128  }
 0x347   : > { %1484 = vsyncadd (!%p970_p7), %s683_s15, 4294967168  ;;  %s37_s21 = sadd.s32 1, %s1567_s21   ;;  %s2516_s0 = sld [smem:[#allocation38_spill]] }
 0x348   : > { %p2300_p6 = scmp.ge.s32.totalorder %s37_s21, 4   ;;  %s2517_s25 = sld [smem:[#allocation39_spill]] }
 0x349   : > { %s2518_s26 = sld [smem:[#allocation56_spill]]  ;;  %s2519_s27 = sld [smem:[#allocation41_spill]] }
 0x34a   : > { %s2520_s1 = sld [smem:[#allocation42_spill]]  ;;  %s2521_s12 = sld [smem:[#allocation43_spill]] }
 0x34b   : > { %s2522_s9 = sld [smem:[#allocation52_spill]]  ;;  %s2523_s10 = sld [smem:[#allocation45_spill]] }
 0x34c   : > { %s2524_s11 = sld [smem:[#allocation46_spill]]  ;;  %s2525_s4 = sld [smem:[#allocation47_spill]] }
 0x34d   : > { %s2526_s15 = sld [smem:[#allocation51_spill]]  ;;  %s2527_s24 = sld [smem:[#allocation49_spill]] }
 0x34e   : > { %s2528_s18 = sld [smem:[#allocation57_spill]]  ;;  %s2529_s28 = smov %s2558_s19 }
 0x34f   : > { %s2530_s29 = smov %s1515_s30  ;;  %s2533_s13 = smov %s1539_s14 }
 0x350   : > { %s2531_s30 = smov %s2521_s12  ;;  %s2532_s12 = smov %s2079_s16 }
 0x351   : > { %s2535_s16 = smov %s1551_s17  ;;  %s2537_s19 = smov %s1563_s20 }
 0x352   : > { %s2534_s14 = smov %s2525_s4  ;;  %s2538_s20 = smov %s2540_s22 }
 0x353   : > { %s2536_s17 = smov %s2527_s24  ;;  %36 = sbr.rel (!%p2300_p6) target bundleno = 40 (0x28), region = 150 }
 0x35a   :  { %688 = vsyncpa [#allocation7], 1 }
 0x35b   :  { %690 = vsyncpa [#allocation7 + $0x1], 1 }
 0x35c   :  { %691 = vsyncpa [#allocation11], 1 }
 0x35d   :  { %693 = vsyncpa [#allocation11 + $0x1], 1 }
 0x35e   :  { %694 = vsyncpa [#allocation14], 1 }
 0x35f   :  { %696 = vsyncpa [#allocation14 + $0x1], 1 }
 0x360   :  { %697 = vsyncpa [#allocation8], 1 }
 0x361   :  { %699 = vsyncpa [#allocation8 + $0x1], 1 }
 0x362   :  { %700 = vsyncpa [#allocation9], 1 }
 0x363   :  { %702 = vsyncpa [#allocation9 + $0x1], 1 }

</bundles_post_ra>
